<compile_context>
chip_gen: v7x
topology: tpu7x:2x2x1
jax: 0.10.0
libtpu: 0.0.40
codegen_flags: <defaults>
</compile_context>

<pallas_src>
import jax
import jax.numpy as jnp
from jax.experimental import pallas as pl
from jax.experimental.pallas import tpu as pltpu


def _res_mlp_kernel(x_ref, w1e_ref, b1e_ref, w2e_ref, b2e_ref, o_ref):
    """Fused residual MLP on one lane-dense row tile.

    x_ref  : (tr, 128)      input tile, G = 128//C points per row (lane = C*p + c)
    w1e_ref: (128, G*H)     block-diagonal kron(I_G, W1), compute dtype
    b1e_ref: (1,  G*H)      tiled b1, f32
    w2e_ref: (G*H, 128)     block-diagonal kron(I_G, W2), compute dtype
    b2e_ref: (1,  128)      tiled b2, f32
    o_ref  : (tr, 128)      output tile = x + sequential(x)
    """
    cdt = w1e_ref.dtype                       # bf16 on v6e/v7x, f32 on v5e/older
    x = x_ref[...]                            # (tr, 128)

    # First projection on the MXU (accumulate in f32), bias on the VPU.
    h = jnp.dot(x.astype(cdt), w1e_ref[...],
                preferred_element_type=jnp.float32)      # (tr, G*H) f32
    h = h + b1e_ref[...]

    # GELU (tanh approximation -> EUP path), in compute dtype.
    g = jax.nn.gelu(h.astype(cdt), approximate=True)

    # Second projection on the MXU, bias + residual add in f32, lane-dense store.
    y = jnp.dot(g, w2e_ref[...], preferred_element_type=jnp.float32)  # (tr, 128)
    y = y + b2e_ref[...]
    o_ref[...] = (x.astype(jnp.float32) + y).astype(o_ref.dtype)


def _default_compute_dtype():
    """bf16 feeds on v6e/v7x (bf16 VPU/EUP/MXU); f32 elementwise on v5e/older."""
    try:
        kind = jax.devices()[0].device_kind.lower()
    except Exception:
        return jnp.float32
    if ("v6" in kind) or ("v7" in kind) or ("7x" in kind):
        return jnp.bfloat16
    return jnp.float32


def _pick_row_tile(rows, hidden_lanes):
    """Largest row tile that keeps per-step VMEM under budget.

    Per grid step (f32 bytes): (tr, hidden_lanes) hidden intermediate plus
    double-buffered (tr, 128) input and output tiles.  Budget stays well
    inside v5e's 16 MiB default scoped VMEM while giving multi-microsecond
    steps (per-step overhead ~0.35 us) once `rows` is large.
    """
    bytes_per_row = 4 * hidden_lanes + 2 * 2 * 4 * 128
    budget = 6 << 20
    cap = max(8, budget // bytes_per_row)
    if rows <= cap:
        return rows                       # single grid step: no pipeline overhead
    cap = (cap // 8) * 8
    best = 8
    for t in range(8, cap + 1, 8):        # rows is padded to a multiple of 8
        if rows % t == 0:
            best = t
    return best


def res_block(x, w1, b1, w2, b2, *, compute_dtype=None, row_tile=None):
    """x: (B, N, C) DiscretizedField values, channels-last. Returns same shape."""
    B, N, C = x.shape
    H = w1.shape[1]
    assert 128 % C == 0, "C must divide 128 (lane packing)"
    GROUP = 128 // C                      # points packed per 128-lane row
    M = B * N

    if compute_dtype is None:
        compute_dtype = _default_compute_dtype()

    # --- layout: free reshapes only (no transposes, no extra HBM round trips) ---
    Mp = ((M + 8 * GROUP - 1) // (8 * GROUP)) * (8 * GROUP)   # rows multiple of 8
    x_flat = x.reshape(M, C)
    if Mp != M:
        x_flat = jnp.pad(x_flat, ((0, Mp - M), (0, 0)))
    R = Mp // GROUP
    x2 = x_flat.reshape(R, GROUP * C)     # (R, 128), lane = C*p + c

    # --- parameter preprocessing (tiny; amortizable / folded into the jit) ---
    # Block-diagonal expansion lets one dense MXU matmul apply the per-point
    # MLP to all GROUP points of a 128-lane row.
    eye = jnp.eye(GROUP, dtype=jnp.float32)
    w1e = jnp.kron(eye, w1.astype(jnp.float32)).astype(compute_dtype)  # (128, G*H)
    w2e = jnp.kron(eye, w2.astype(jnp.float32)).astype(compute_dtype)  # (G*H, 128)
    b1e = jnp.tile(b1.reshape(-1).astype(jnp.float32), GROUP).reshape(1, GROUP * H)
    b2e = jnp.tile(b2.reshape(-1).astype(jnp.float32), GROUP).reshape(1, GROUP * C)

    tr = row_tile if row_tile is not None else _pick_row_tile(R, GROUP * H)
    assert R % tr == 0

    out2 = pl.pallas_call(
        _res_mlp_kernel,
        out_shape=jax.ShapeDtypeStruct((R, GROUP * C), x.dtype),
        grid=(R // tr,),
        in_specs=[
            pl.BlockSpec((tr, GROUP * C), lambda i: (i, 0)),       # x row tile
            pl.BlockSpec((GROUP * C, GROUP * H), lambda i: (0, 0)),  # W1e (resident)
            pl.BlockSpec((1, GROUP * H), lambda i: (0, 0)),          # b1e
            pl.BlockSpec((GROUP * H, GROUP * C), lambda i: (0, 0)),  # W2e (resident)
            pl.BlockSpec((1, GROUP * C), lambda i: (0, 0)),          # b2e
        ],
        out_specs=pl.BlockSpec((tr, GROUP * C), lambda i: (i, 0)),
        compiler_params=pltpu.CompilerParams(
            dimension_semantics=("parallel",),
            vmem_limit_bytes=32 * 1024 * 1024,
        ),
        cost_estimate=pl.CostEstimate(
            flops=4 * C * H * M,
            transcendentals=H * M,
            bytes_accessed=4 * (2 * M * C + 2 * C * H + H + C),
        ),
    )(x2, w1e, b1e, w2e, b2e)

    out_flat = out2.reshape(Mp, C)
    if Mp != M:
        out_flat = out_flat[:M]
    return out_flat.reshape(B, N, C)


def _reference(x, w1, b1, w2, b2):
    xf = x.astype(jnp.float32)
    h = jax.nn.gelu(xf @ w1 + b1, approximate=True)
    return (xf + (h @ w2 + b2)).astype(x.dtype)


if __name__ == "__main__":
    key = jax.random.PRNGKey(0)
    kx, k1, k2, k3, k4 = jax.random.split(key, 5)

    B, N, C, H = 2, 256, 4, 32   # 16x16 spatial discretization -> N=256 points

    x = jax.random.normal(kx, (B, N, C), dtype=jnp.float32)

    # deterministic parameter init (synthetic, not a checkpoint load)
    w1 = jax.random.normal(k1, (C, H), dtype=jnp.float32) * (1.0 / jnp.sqrt(C))
    b1 = jax.random.normal(k2, (1, H), dtype=jnp.float32) * 0.01
    w2 = jax.random.normal(k3, (H, C), dtype=jnp.float32) * (1.0 / jnp.sqrt(H))
    b2 = jax.random.normal(k4, (1, C), dtype=jnp.float32) * 0.01

    res_block_jit = jax.jit(res_block)
    y = jax.block_until_ready(res_block_jit(x, w1, b1, w2, b2))

    y_ref = _reference(x, w1, b1, w2, b2)
    assert y.shape == x.shape and y.dtype == x.dtype

    # f32 path (v5e/older) gets a tight check; bf16 feeds (v6e/v7x) a looser one.
    tol = 1e-5 if _default_compute_dtype() == jnp.float32 else 5e-2
    assert jnp.allclose(y, y_ref, atol=tol, rtol=tol), "mismatch vs reference"

    print("KERNEL_OK")
</pallas_src>

<mosaic_0001>
module attributes {stable_mosaic.version = 11 : i64} {
  func.func @_res_mlp_kernel(%arg0: i32, %arg1: memref<16x128xf32, #tpu.memory_space<vmem>>, %arg2: memref<128x1024xf32, #tpu.memory_space<vmem>>, %arg3: memref<1x1024xf32, #tpu.memory_space<vmem>>, %arg4: memref<1024x128xf32, #tpu.memory_space<vmem>>, %arg5: memref<1x128xf32, #tpu.memory_space<vmem>>, %arg6: memref<16x128xf32, #tpu.memory_space<vmem>>) attributes {dimension_semantics = [#tpu.dimension_semantics<parallel>], iteration_bounds = array<i64: 1>, scalar_prefetch = 0 : i64, scratch_operands = 0 : i64, tpu.core_type = #tpu.core_type<tc>, window_params = [{transform_indices = @transform_0, window_bounds = array<i64: 16, 128>}, {pipeline_mode = #tpu.pipeline_mode<synchronous>, transform_indices = @transform_1, window_bounds = array<i64: 128, 1024>}, {pipeline_mode = #tpu.pipeline_mode<synchronous>, transform_indices = @transform_2, window_bounds = array<i64: 1, 1024>}, {pipeline_mode = #tpu.pipeline_mode<synchronous>, transform_indices = @transform_3, window_bounds = array<i64: 1024, 128>}, {pipeline_mode = #tpu.pipeline_mode<synchronous>, transform_indices = @transform_4, window_bounds = array<i64: 1, 128>}, {transform_indices = @transform_5, window_bounds = array<i64: 16, 128>}]} {
    %c0 = arith.constant 0 : index
    %c0_0 = arith.constant 0 : index
    %0 = vector.load %arg1[%c0, %c0_0] : memref<16x128xf32, #tpu.memory_space<vmem>>, vector<16x128xf32>
    %c0_1 = arith.constant 0 : index
    %c0_2 = arith.constant 0 : index
    %1 = vector.load %arg2[%c0_1, %c0_2] : memref<128x1024xf32, #tpu.memory_space<vmem>>, vector<128x1024xf32>
    %cst = arith.constant dense<0.000000e+00> : vector<16x1024xf32>
    %2 = tpu.matmul %0, %1, %cst {dimension_numbers = #tpu.dot_dimension_numbers<[1], [0], [0], [1], [0, 0, 1, 1], [], []>} : vector<16x128xf32>, vector<128x1024xf32>, vector<16x1024xf32> -> vector<16x1024xf32>
    %c0_3 = arith.constant 0 : index
    %c0_4 = arith.constant 0 : index
    %3 = vector.load %arg3[%c0_3, %c0_4] : memref<1x1024xf32, #tpu.memory_space<vmem>>, vector<1x1024xf32>
    %4 = vector.broadcast %3 : vector<1x1024xf32> to vector<16x1024xf32>
    %5 = arith.addf %2, %4 : vector<16x1024xf32>
    %6 = arith.mulf %5, %5 : vector<16x1024xf32>
    %7 = arith.mulf %5, %6 : vector<16x1024xf32>
    %cst_5 = arith.constant 4.471500e-02 : f32
    %8 = vector.broadcast %cst_5 : f32 to vector<16x1024xf32>
    %9 = arith.mulf %8, %7 : vector<16x1024xf32>
    %10 = arith.addf %5, %9 : vector<16x1024xf32>
    %cst_6 = arith.constant 0.797884583 : f32
    %11 = vector.broadcast %cst_6 : f32 to vector<16x1024xf32>
    %12 = arith.mulf %11, %10 : vector<16x1024xf32>
    %13 = math.tanh %12 : vector<16x1024xf32>
    %cst_7 = arith.constant 1.000000e+00 : f32
    %14 = vector.broadcast %cst_7 : f32 to vector<16x1024xf32>
    %15 = arith.addf %14, %13 : vector<16x1024xf32>
    %cst_8 = arith.constant 5.000000e-01 : f32
    %16 = vector.broadcast %cst_8 : f32 to vector<16x1024xf32>
    %17 = arith.mulf %16, %15 : vector<16x1024xf32>
    %18 = arith.mulf %5, %17 : vector<16x1024xf32>
    %c0_9 = arith.constant 0 : index
    %c0_10 = arith.constant 0 : index
    %19 = vector.load %arg4[%c0_9, %c0_10] : memref<1024x128xf32, #tpu.memory_space<vmem>>, vector<1024x128xf32>
    %cst_11 = arith.constant dense<0.000000e+00> : vector<16x128xf32>
    %20 = tpu.matmul %18, %19, %cst_11 {dimension_numbers = #tpu.dot_dimension_numbers<[1], [0], [0], [1], [0, 0, 1, 1], [], []>} : vector<16x1024xf32>, vector<1024x128xf32>, vector<16x128xf32> -> vector<16x128xf32>
    %c0_12 = arith.constant 0 : index
    %c0_13 = arith.constant 0 : index
    %21 = vector.load %arg5[%c0_12, %c0_13] : memref<1x128xf32, #tpu.memory_space<vmem>>, vector<1x128xf32>
    %22 = vector.broadcast %21 : vector<1x128xf32> to vector<16x128xf32>
    %23 = arith.addf %20, %22 : vector<16x128xf32>
    %24 = arith.addf %0, %23 : vector<16x128xf32>
    %c0_14 = arith.constant 0 : index
    %c0_15 = arith.constant 0 : index
    %25 = vector.load %arg6[%c0_14, %c0_15] : memref<16x128xf32, #tpu.memory_space<vmem>>, vector<16x128xf32>
    tpu.vector_store %arg6[%c0_14, %c0_15], %24 {strides = array<i32>} : memref<16x128xf32, #tpu.memory_space<vmem>>, vector<16x128xf32>,
    return
  }
  func.func @transform_0(%arg0: i32) -> (i32, i32) {
    %c0_i32 = arith.constant 0 : i32
    %c0_i32_0 = arith.constant 0 : i32
    return %arg0, %c0_i32 : i32, i32
  }
  func.func @transform_1(%arg0: i32) -> (i32, i32) {
    %c0_i32 = arith.constant 0 : i32
    %c0_i32_0 = arith.constant 0 : i32
    %c0_i32_1 = arith.constant 0 : i32
    return %c0_i32, %c0_i32_0 : i32, i32
  }
  func.func @transform_2(%arg0: i32) -> (i32, i32) {
    %c0_i32 = arith.constant 0 : i32
    %c0_i32_0 = arith.constant 0 : i32
    %c0_i32_1 = arith.constant 0 : i32
    return %c0_i32, %c0_i32_0 : i32, i32
  }
  func.func @transform_3(%arg0: i32) -> (i32, i32) {
    %c0_i32 = arith.constant 0 : i32
    %c0_i32_0 = arith.constant 0 : i32
    %c0_i32_1 = arith.constant 0 : i32
    return %c0_i32, %c0_i32_0 : i32, i32
  }
  func.func @transform_4(%arg0: i32) -> (i32, i32) {
    %c0_i32 = arith.constant 0 : i32
    %c0_i32_0 = arith.constant 0 : i32
    %c0_i32_1 = arith.constant 0 : i32
    return %c0_i32, %c0_i32_0 : i32, i32
  }
  func.func @transform_5(%arg0: i32) -> (i32, i32) {
    %c0_i32 = arith.constant 0 : i32
    %c0_i32_0 = arith.constant 0 : i32
    return %arg0, %c0_i32 : i32, i32
  }
}

</mosaic_0001>

<bundles_post_ra>
// kernel: tile.10
= control target key start
LH: loop header
LB: loop body
LE: loop exit
PB: predicated region body
PF: predicated region fallthrough
CT: control target
= control target key end

     0   :  { %s40_s0 = inlined_call_operand.vmem [shape: f32[32], index: 0, kind: input, shape index: {}]   ;;  %s41_s1 = inlined_call_operand.vmem [shape: f32[32,32], index: 1, kind: output, shape index: {}]  }
   0x1   :  { %v4_v0 = vld [vmem:[%s40_s0] ss:$0 sm:$0xff] }
   0x2   :  { %5 = vst [vmem:[%s41_s1] sm:$0xff] %v4_v0  ;;  %12 = vst [vmem:[%s41_s1 + $0x8] sm:$0xff] %v4_v0 }
   0x3   :  { %13 = vst [vmem:[%s41_s1 + $0x10] sm:$0xff] %v4_v0  ;;  %14 = vst [vmem:[%s41_s1 + $0x18] sm:$0xff] %v4_v0 }

// kernel: tile.11
= control target key start
LH: loop header
LB: loop body
LE: loop exit
PB: predicated region body
PF: predicated region fallthrough
CT: control target
= control target key end

     0   :  { %s93_s8 = smov 96   ;;  %vm3_vm0 = vcmask 261120   ;;  %s95_s15 = smov 64   ;;  %vm10_vm1 = vcmask 1048320   ;;  %vm17_vm2 = vcmask 785920   ;;  %vm24_vm3 = vcmask 523520   ;;  %s142_s0 = inlined_call_operand.vmem [shape: f32[32,32], index: 0, kind: input, shape index: {}]   ;;  %s143_s1 = inlined_call_operand.vmem [shape: f32[1,1024], index: 1, kind: output, shape index: {}]  }
   0x1   :  { %v80_v0 = vld [vmem:[%s142_s0 + $0x3] ss:$4 sm:$0xff]   ;;  %v82_v1 = vld [vmem:[%s142_s0 + $0x1] ss:$4 sm:$0xff]   ;;  %v2_v2 = vld [vmem:[%s142_s0] ss:$4 sm:$0xff]  }
   0x2   :  { %8 = vrot.lane.b32.xlu0 %v80_v0, %s93_s8  ;;  %v81_v3 = vld [vmem:[%s142_s0 + $0x2] ss:$4 sm:$0xff]   ;;  %s94_s0 = smov 32   ;;  %4 = vst.msk [vmem:[#allocation0] ss:$8 sm:$0xf] %vm3_vm0, %v2_v2  }
   0x3   :  { %22 = vrot.lane.b32.xlu1 %v82_v1, %s94_s0  ;;  %5 = vst.msk [vmem:[#allocation0] ss:$8 sm:$0xf0] %vm3_vm0, %v2_v2  }
   0x6   :  { %15 = vrot.lane.b32.xlu0 %v81_v3, %s95_s15 }
  0x74   :  { %v9_v4 = vpop.permute.xlu0 %8  }
  0x75   :  { %11 = vst.msk [vmem:[#allocation0] ss:$8 sm:$0xf] %vm10_vm1, %v9_v4   ;;  %12 = vst.msk [vmem:[#allocation0] ss:$8 sm:$0xf0] %vm10_vm1, %v9_v4   ;;  %v23_v5 = vpop.permute.xlu1 %22  }
  0x78   :  { %v16_v6 = vpop.permute.xlu0 %15  }
  0x79   :  { %18 = vst.msk [vmem:[#allocation0] ss:$8 sm:$0xf] %vm17_vm2, %v16_v6   ;;  %19 = vst.msk [vmem:[#allocation0] ss:$8 sm:$0xf0] %vm17_vm2, %v16_v6  }
  0x7a   :  { %25 = vst.msk [vmem:[#allocation0] ss:$8 sm:$0xf] %vm24_vm3, %v23_v5   ;;  %26 = vst.msk [vmem:[#allocation0] ss:$8 sm:$0xf0] %vm24_vm3, %v23_v5  }
  0x81   :  { %v30_v7 = vld [vmem:[#allocation0] sm:$0x1]  ;;  %v34_v8 = vld [vmem:[#allocation0 + $0x8] sm:$0x1]  ;;  %v39_v9 = vld [vmem:[#allocation0 + $0x10] sm:$0x1] }
  0x82   :  { %32 = vst [vmem:[%s143_s1] sm:$0x1] %v30_v7  ;;  %83 = vst [vmem:[%s143_s1 + $0x1] sm:$0x1] %v34_v8  ;;  %v45_v10 = vld [vmem:[#allocation0 + $0x18] sm:$0x1] }
  0x83   :  { %84 = vst [vmem:[%s143_s1 + $0x2] sm:$0x1] %v39_v9  ;;  %v51_v11 = vld [vmem:[#allocation0 + $0x20] sm:$0x1]  ;;  %v57_v12 = vld [vmem:[#allocation0 + $0x28] sm:$0x1] }
  0x84   :  { %85 = vst [vmem:[%s143_s1 + $0x3] sm:$0x1] %v45_v10  ;;  %86 = vst [vmem:[%s143_s1 + $0x4] sm:$0x1] %v51_v11  ;;  %v63_v13 = vld [vmem:[#allocation0 + $0x30] sm:$0x1] }
  0x85   :  { %87 = vst [vmem:[%s143_s1 + $0x5] sm:$0x1] %v57_v12  ;;  %v69_v14 = vld [vmem:[#allocation0 + $0x38] sm:$0x1]  ;;  %88 = vst [vmem:[%s143_s1 + $0x6] sm:$0x1] %v63_v13 }
  0x86   :  { %89 = vst [vmem:[%s143_s1 + $0x7] sm:$0x1] %v69_v14 }

// kernel: tile.14
= control target key start
LH: loop header
LB: loop body
LE: loop exit
PB: predicated region body
PF: predicated region fallthrough
CT: control target
= control target key end

     0   :  { %s40_s0 = inlined_call_operand.vmem [shape: f32[4], index: 0, kind: input, shape index: {}]   ;;  %s41_s1 = inlined_call_operand.vmem [shape: f32[32,4], index: 1, kind: output, shape index: {}]  }
   0x1   :  { %v4_v0 = vld [vmem:[%s40_s0] ss:$0 sm:$0xff] }
   0x2   :  { %5 = vst [vmem:[%s41_s1] sm:$0xff] %v4_v0  ;;  %12 = vst [vmem:[%s41_s1 + $0x8] sm:$0xff] %v4_v0 }
   0x3   :  { %13 = vst [vmem:[%s41_s1 + $0x10] sm:$0xff] %v4_v0  ;;  %14 = vst [vmem:[%s41_s1 + $0x18] sm:$0xff] %v4_v0 }

// kernel: tile.15
= control target key start
LH: loop header
LB: loop body
LE: loop exit
PB: predicated region body
PF: predicated region fallthrough
CT: control target
= control target key end

     0   :  { %s259_s10 = smov 124   ;;  %s260_s11 = smov 116   ;;  %vm3_vm0 = vcmask 31744   ;;  %vm9_vm1 = vcmask 1048544   ;;  %vm15_vm2 = vcmask 1015744   ;;  %vm21_vm3 = vcmask 982944   ;;  %s399_s0 = inlined_call_operand.vmem [shape: f32[32,4], index: 0, kind: input, shape index: {}]   ;;  %s400_s1 = inlined_call_operand.vmem [shape: f32[1,128], index: 1, kind: output, shape index: {}]  }
   0x1   :  { %v197_v0 = vld [vmem:[%s399_s0 + $0x1f] sm:$0x1]   ;;  %v199_v1 = vld [vmem:[%s399_s0 + $0x1d] sm:$0x1]   ;;  %v198_v2 = vld [vmem:[%s399_s0 + $0x1e] sm:$0x1]  }
   0x2   :  { %7 = vrot.lane.b32.xlu0 %v197_v0, %s259_s10  ;;  %19 = vrot.lane.b32.xlu1 %v199_v1, %s260_s11  ;;  %v200_v3 = vld [vmem:[%s399_s0 + $0x1c] sm:$0x1]   ;;  %s261_s16 = smov 120   ;;  %s262_s17 = smov 112   ;;  %v201_v4 = vld [vmem:[%s399_s0 + $0x1b] sm:$0x1]  }
   0x3   :  { %v202_v5 = vld [vmem:[%s399_s0 + $0x1a] sm:$0x1]   ;;  %s263_s22 = smov 108   ;;  %s264_s23 = smov 104   ;;  %v203_v6 = vld [vmem:[%s399_s0 + $0x19] sm:$0x1]  }
   0x4   :  { %v204_v7 = vld [vmem:[%s399_s0 + $0x18] sm:$0x1]   ;;  %s265_s28 = smov 100   ;;  %s266_s29 = smov 96   ;;  %v205_v8 = vld [vmem:[%s399_s0 + $0x17] sm:$0x1]  }
   0x5   :  { %v206_v9 = vld [vmem:[%s399_s0 + $0x16] sm:$0x1]   ;;  %v2_v10 = vld [vmem:[%s399_s0] sm:$0x1]   ;;  %s267_s7 = smov 92   ;;  %s268_s8 = smov 88  }
   0x6   :  { %13 = vrot.lane.b32.xlu0 %v198_v2, %s261_s16  ;;  %25 = vrot.lane.b32.xlu1 %v200_v3, %s262_s17  ;;  %4 = vst.msk [vmem:[#allocation0] sm:$0x1] %vm3_vm0, %v2_v10   ;;  %v207_v11 = vld [vmem:[%s399_s0 + $0x15] sm:$0x1]   ;;  %v208_v12 = vld [vmem:[%s399_s0 + $0x14] sm:$0x1]  }
   0x7   :  { %s269_s13 = smov 84   ;;  %s270_s14 = smov 80   ;;  %v209_v13 = vld [vmem:[%s399_s0 + $0x13] sm:$0x1]   ;;  %v210_v14 = vld [vmem:[%s399_s0 + $0x12] sm:$0x1]  }
   0x8   :  { %s271_s19 = smov 76   ;;  %s272_s20 = smov 72   ;;  %v211_v15 = vld [vmem:[%s399_s0 + $0x11] sm:$0x1]   ;;  %v212_v16 = vld [vmem:[%s399_s0 + $0x10] sm:$0x1]  }
   0x9   :  { %s273_s25 = smov 68   ;;  %s274_s26 = smov 64   ;;  %v213_v17 = vld [vmem:[%s399_s0 + $0xf] sm:$0x1]   ;;  %v214_v18 = vld [vmem:[%s399_s0 + $0xe] sm:$0x1]  }
   0xa   :  { %31 = vrot.lane.b32.xlu0 %v201_v4, %s263_s22  ;;  %37 = vrot.lane.b32.xlu1 %v202_v5, %s264_s23  ;;  %s275_s2 = smov 60   ;;  %s276_s3 = smov 56   ;;  %v215_v19 = vld [vmem:[%s399_s0 + $0xd] sm:$0x1]   ;;  %v216_v20 = vld [vmem:[%s399_s0 + $0xc] sm:$0x1]  }
   0xb   :  { %s278_s9 = smov 48   ;;  %v217_v21 = vld [vmem:[%s399_s0 + $0xb] sm:$0x1]   ;;  %v218_v22 = vld [vmem:[%s399_s0 + $0xa] sm:$0x1]   ;;  %s280_s15 = smov 40  }
   0xc   :  { %v219_v23 = vld [vmem:[%s399_s0 + $0x9] sm:$0x1]   ;;  %v220_v24 = vld [vmem:[%s399_s0 + $0x8] sm:$0x1]   ;;  %s282_s21 = smov 32   ;;  %s284_s27 = smov 24  }
   0xd   :  { %v221_v25 = vld [vmem:[%s399_s0 + $0x7] sm:$0x1]   ;;  %v222_v26 = vld [vmem:[%s399_s0 + $0x6] sm:$0x1]   ;;  %v223_v27 = vld [vmem:[%s399_s0 + $0x5] sm:$0x1]  }
   0xe   :  { %43 = vrot.lane.b32.xlu0 %v203_v6, %s265_s28  ;;  %49 = vrot.lane.b32.xlu1 %v204_v7, %s266_s29  ;;  %v224_v28 = vld [vmem:[%s399_s0 + $0x4] sm:$0x1]   ;;  %s286_s4 = smov 16   ;;  %v225_v29 = vld [vmem:[%s399_s0 + $0x3] sm:$0x1]   ;;  %s288_s10 = smov 8  }
   0xf   :  { %v226_v30 = vld [vmem:[%s399_s0 + $0x2] sm:$0x1]   ;;  %v227_v31 = vld [vmem:[%s399_s0 + $0x1] sm:$0x1]   ;;  %s289_s0 = smov 4   ;;  %vm27_vm4 = vcmask 950144  }
  0x10   :  { %vm33_vm5 = vcmask 917344   ;;  %vm39_vm6 = vcmask 884544   ;;  %vm45_vm7 = vcmask 851744   ;;  %vm51_vm8 = vcmask 818944  }
  0x11   :  { %vm57_vm9 = vcmask 786144   ;;  %vm63_vm10 = vcmask 753344   ;;  %vm69_vm11 = vcmask 720544   ;;  %vm75_vm12 = vcmask 687744  }
  0x12   :  { %55 = vrot.lane.b32.xlu0 %v205_v8, %s267_s7  ;;  %61 = vrot.lane.b32.xlu1 %v206_v9, %s268_s8  ;;  %s277_s8 = smov 52   ;;  %vm81_vm13 = vcmask 654944   ;;  %vm87_vm14 = vcmask 622144   ;;  %vm93_vm15 = vcmask 589344   ;;  %vm99_vm0 = vcmask 556544  }
  0x16   :  { %67 = vrot.lane.b32.xlu0 %v207_v11, %s269_s13  ;;  %73 = vrot.lane.b32.xlu1 %v208_v12, %s270_s14  ;;  %s279_s14 = smov 44  }
  0x1a   :  { %79 = vrot.lane.b32.xlu0 %v209_v13, %s271_s19  ;;  %85 = vrot.lane.b32.xlu1 %v210_v14, %s272_s20  ;;  %s281_s20 = smov 36  }
  0x1e   :  { %91 = vrot.lane.b32.xlu0 %v211_v15, %s273_s25  ;;  %97 = vrot.lane.b32.xlu1 %v212_v16, %s274_s26  ;;  %s283_s26 = smov 28  }
  0x22   :  { %103 = vrot.lane.b32.xlu0 %v213_v17, %s275_s2  ;;  %109 = vrot.lane.b32.xlu1 %v214_v18, %s276_s3  ;;  %s285_s3 = smov 20  }
  0x26   :  { %115 = vrot.lane.b32.xlu0 %v215_v19, %s277_s8  ;;  %121 = vrot.lane.b32.xlu1 %v216_v20, %s278_s9  ;;  %s287_s9 = smov 12  }
  0x2a   :  { %127 = vrot.lane.b32.xlu0 %v217_v21, %s279_s14  ;;  %133 = vrot.lane.b32.xlu1 %v218_v22, %s280_s15 }
  0x2e   :  { %139 = vrot.lane.b32.xlu0 %v219_v23, %s281_s20  ;;  %145 = vrot.lane.b32.xlu1 %v220_v24, %s282_s21 }
  0x32   :  { %151 = vrot.lane.b32.xlu0 %v221_v25, %s283_s26  ;;  %157 = vrot.lane.b32.xlu1 %v222_v26, %s284_s27 }
  0x36   :  { %163 = vrot.lane.b32.xlu0 %v223_v27, %s285_s3  ;;  %169 = vrot.lane.b32.xlu1 %v224_v28, %s286_s4 }
  0x3a   :  { %175 = vrot.lane.b32.xlu0 %v225_v29, %s287_s9  ;;  %181 = vrot.lane.b32.xlu1 %v226_v30, %s288_s10 }
  0x3e   :  { %187 = vrot.lane.b32.xlu0 %v227_v31, %s289_s0 }
  0x74   :  { %v8_v32 = vpop.permute.xlu0 %7   ;;  %v20_v33 = vpop.permute.xlu1 %19  }
  0x75   :  { %10 = vst.msk [vmem:[#allocation0] sm:$0x1] %vm9_vm1, %v8_v32   ;;  %vm105_vm1 = vcmask 523744  }
  0x78   :  { %v14_v34 = vpop.permute.xlu0 %13   ;;  %v26_v35 = vpop.permute.xlu1 %25  }
  0x79   :  { %16 = vst.msk [vmem:[#allocation0] sm:$0x1] %vm15_vm2, %v14_v34   ;;  %vm111_vm2 = vcmask 490944  }
  0x7a   :  { %22 = vst.msk [vmem:[#allocation0] sm:$0x1] %vm21_vm3, %v20_v33   ;;  %vm117_vm3 = vcmask 458144  }
  0x7b   :  { %28 = vst.msk [vmem:[#allocation0] sm:$0x1] %vm27_vm4, %v26_v35   ;;  %vm123_vm4 = vcmask 425344  }
  0x7c   :  { %v32_v36 = vpop.permute.xlu0 %31   ;;  %v38_v37 = vpop.permute.xlu1 %37  }
  0x7d   :  { %34 = vst.msk [vmem:[#allocation0] sm:$0x1] %vm33_vm5, %v32_v36   ;;  %vm129_vm5 = vcmask 392544  }
  0x7e   :  { %40 = vst.msk [vmem:[#allocation0] sm:$0x1] %vm39_vm6, %v38_v37   ;;  %vm135_vm6 = vcmask 359744  }
  0x80   :  { %v44_v38 = vpop.permute.xlu0 %43   ;;  %v50_v39 = vpop.permute.xlu1 %49  }
  0x81   :  { %46 = vst.msk [vmem:[#allocation0] sm:$0x1] %vm45_vm7, %v44_v38   ;;  %vm141_vm7 = vcmask 326944  }
  0x82   :  { %52 = vst.msk [vmem:[#allocation0] sm:$0x1] %vm51_vm8, %v50_v39   ;;  %vm147_vm8 = vcmask 294144  }
  0x84   :  { %v56_v40 = vpop.permute.xlu0 %55   ;;  %v62_v41 = vpop.permute.xlu1 %61  }
  0x85   :  { %58 = vst.msk [vmem:[#allocation0] sm:$0x1] %vm57_vm9, %v56_v40   ;;  %vm153_vm9 = vcmask 261344  }
  0x86   :  { %64 = vst.msk [vmem:[#allocation0] sm:$0x1] %vm63_vm10, %v62_v41   ;;  %vm159_vm10 = vcmask 228544  }
  0x88   :  { %v68_v42 = vpop.permute.xlu0 %67   ;;  %v74_v43 = vpop.permute.xlu1 %73  }
  0x89   :  { %70 = vst.msk [vmem:[#allocation0] sm:$0x1] %vm69_vm11, %v68_v42   ;;  %vm165_vm11 = vcmask 195744  }
  0x8a   :  { %76 = vst.msk [vmem:[#allocation0] sm:$0x1] %vm75_vm12, %v74_v43   ;;  %vm171_vm12 = vcmask 162944  }
  0x8c   :  { %v80_v44 = vpop.permute.xlu0 %79   ;;  %v86_v45 = vpop.permute.xlu1 %85  }
  0x8d   :  { %82 = vst.msk [vmem:[#allocation0] sm:$0x1] %vm81_vm13, %v80_v44   ;;  %vm177_vm13 = vcmask 130144  }
  0x8e   :  { %88 = vst.msk [vmem:[#allocation0] sm:$0x1] %vm87_vm14, %v86_v45   ;;  %vm183_vm14 = vcmask 97344  }
  0x90   :  { %v92_v46 = vpop.permute.xlu0 %91   ;;  %v98_v47 = vpop.permute.xlu1 %97  }
  0x91   :  { %94 = vst.msk [vmem:[#allocation0] sm:$0x1] %vm93_vm15, %v92_v46   ;;  %vm189_vm15 = vcmask 64544  }
  0x92   :  { %100 = vst.msk [vmem:[#allocation0] sm:$0x1] %vm99_vm0, %v98_v47  }
  0x94   :  { %v104_v48 = vpop.permute.xlu0 %103   ;;  %v110_v49 = vpop.permute.xlu1 %109  }
  0x95   :  { %106 = vst.msk [vmem:[#allocation0] sm:$0x1] %vm105_vm1, %v104_v48  }
  0x96   :  { %112 = vst.msk [vmem:[#allocation0] sm:$0x1] %vm111_vm2, %v110_v49  }
  0x98   :  { %v116_v50 = vpop.permute.xlu0 %115   ;;  %v122_v51 = vpop.permute.xlu1 %121  }
  0x99   :  { %118 = vst.msk [vmem:[#allocation0] sm:$0x1] %vm117_vm3, %v116_v50  }
  0x9a   :  { %124 = vst.msk [vmem:[#allocation0] sm:$0x1] %vm123_vm4, %v122_v51  }
  0x9c   :  { %v128_v52 = vpop.permute.xlu0 %127   ;;  %v134_v53 = vpop.permute.xlu1 %133  }
  0x9d   :  { %130 = vst.msk [vmem:[#allocation0] sm:$0x1] %vm129_vm5, %v128_v52  }
  0x9e   :  { %136 = vst.msk [vmem:[#allocation0] sm:$0x1] %vm135_vm6, %v134_v53  }
  0xa0   :  { %v140_v54 = vpop.permute.xlu0 %139   ;;  %v146_v55 = vpop.permute.xlu1 %145  }
  0xa1   :  { %142 = vst.msk [vmem:[#allocation0] sm:$0x1] %vm141_vm7, %v140_v54  }
  0xa2   :  { %148 = vst.msk [vmem:[#allocation0] sm:$0x1] %vm147_vm8, %v146_v55  }
  0xa4   :  { %v152_v56 = vpop.permute.xlu0 %151   ;;  %v158_v57 = vpop.permute.xlu1 %157  }
  0xa5   :  { %154 = vst.msk [vmem:[#allocation0] sm:$0x1] %vm153_vm9, %v152_v56  }
  0xa6   :  { %160 = vst.msk [vmem:[#allocation0] sm:$0x1] %vm159_vm10, %v158_v57  }
  0xa8   :  { %v164_v58 = vpop.permute.xlu0 %163   ;;  %v170_v59 = vpop.permute.xlu1 %169  }
  0xa9   :  { %166 = vst.msk [vmem:[#allocation0] sm:$0x1] %vm165_vm11, %v164_v58  }
  0xaa   :  { %172 = vst.msk [vmem:[#allocation0] sm:$0x1] %vm171_vm12, %v170_v59  }
  0xac   :  { %v176_v60 = vpop.permute.xlu0 %175   ;;  %v182_v61 = vpop.permute.xlu1 %181  }
  0xad   :  { %178 = vst.msk [vmem:[#allocation0] sm:$0x1] %vm177_vm13, %v176_v60  }
  0xae   :  { %184 = vst.msk [vmem:[#allocation0] sm:$0x1] %vm183_vm14, %v182_v61  }
  0xb0   :  { %v188_v62 = vpop.permute.xlu0 %187  }
  0xb1   :  { %190 = vst.msk [vmem:[#allocation0] sm:$0x1] %vm189_vm15, %v188_v62  }
  0xb8   :  { %v194_v63 = vld [vmem:[#allocation0] sm:$0x1] }
  0xb9   :  { %196 = vst [vmem:[%s400_s1] sm:$0x1] %v194_v63 }

// kernel: res_block.1
= control target key start
LH: loop header
LB: loop body
LE: loop exit
PB: predicated region body
PF: predicated region fallthrough
CT: control target
= control target key end

     0   :  { %v1531_v3 = vmov 0.0   ;;  %s2666_s1 = inlined_call_operand.vmem [shape: f32[128,1024], index: 1, kind: input, shape index: {}]   ;;  %s2667_s0 = inlined_call_operand.vmem [shape: f32[16,128], index: 0, kind: input, shape index: {}]   ;;  %s2668_s3 = inlined_call_operand.vmem [shape: f32[1024,128], index: 3, kind: input, shape index: {}]   ;;  %s2669_s2 = inlined_call_operand.vmem [shape: f32[1,1024], index: 2, kind: input, shape index: {}]   ;;  %s2670_s4 = inlined_call_operand.vmem [shape: f32[1,128], index: 4, kind: input, shape index: {}]   ;;  %s2671_s5 = inlined_call_operand.vmem [shape: f32[16,128], index: 5, kind: output, shape index: {}]  }
   0x1   :  { %v23_v0 = vld [vmem:[%s2666_s1 + $0x8] sm:$0xff]  ;;  %v25_v2 = vld [vmem:[%s2666_s1 + $0x18] sm:$0xff]  ;;  %256 = vmatprep.mubr.f32.mxu0 %v1531_v3  ;;  %333 = vmatprep.mubr.f32.mxu1 %v1531_v3  ;;  %v22_v6 = vld [vmem:[%s2666_s1] sm:$0xff] }
   0x2   :  { %v31_v1 = vld [vmem:[%s2666_s1 + $0x48] sm:$0xff]  ;;  %v33_v5 = vld [vmem:[%s2666_s1 + $0x58] sm:$0xff]  ;;  %v30_v7 = vld [vmem:[%s2666_s1 + $0x40] sm:$0xff] }
   0x3   :  { %v1240_v4 = vpack.c.bf16 %v31_v1, %v23_v0  ;;  %v1272_v8 = vpack.c.bf16 %v33_v5, %v25_v2  ;;  %v1242_v9 = vpack.c.bf16 %v30_v7, %v22_v6  ;;  %v24_v10 = vld [vmem:[%s2666_s1 + $0x10] sm:$0xff]  ;;  %v39_v12 = vld [vmem:[%s2666_s1 + $0x88] sm:$0xff]  ;;  %v41_v15 = vld [vmem:[%s2666_s1 + $0x98] sm:$0xff] }
   0x4   :  { %v32_v11 = vld [vmem:[%s2666_s1 + $0x50] sm:$0xff]  ;;  %v47_v14 = vld [vmem:[%s2666_s1 + $0xc8] sm:$0xff]  ;;  %v49_v16 = vld [vmem:[%s2666_s1 + $0xd8] sm:$0xff] }
   0x5   :  { %1241 = vmatprep.subr.bf16.mxu0 %v1240_v4  ;;  %v1274_v13 = vpack.c.bf16 %v32_v11, %v24_v10  ;;  %1273 = vmatprep.subr.bf16.mxu1 %v1272_v8  ;;  %v1244_v17 = vpack.c.bf16 %v47_v14, %v39_v12  ;;  %v1276_v18 = vpack.c.bf16 %v49_v16, %v41_v15  ;;  %v38_v19 = vld [vmem:[%s2666_s1 + $0x80] sm:$0xff]  ;;  %v40_v21 = vld [vmem:[%s2666_s1 + $0x90] sm:$0xff]  ;;  %v55_v24 = vld [vmem:[%s2666_s1 + $0x108] sm:$0xff] }
   0x6   :  { %1243 = vmatpush1.bf16.msra.mxu0 %v1242_v9  ;;  %v46_v20 = vld [vmem:[%s2666_s1 + $0xc0] sm:$0xff]  ;;  %v48_v23 = vld [vmem:[%s2666_s1 + $0xd0] sm:$0xff]  ;;  %v63_v25 = vld [vmem:[%s2666_s1 + $0x148] sm:$0xff] }
   0x7   :  { %1275 = vmatpush1.bf16.msra.mxu1 %v1274_v13  ;;  %v1246_v22 = vpack.c.bf16 %v46_v20, %v38_v19  ;;  %1245 = vmatprep.subr.bf16.mxu0 %v1244_v17  ;;  %v1278_v26 = vpack.c.bf16 %v48_v23, %v40_v21  ;;  %v1248_v27 = vpack.c.bf16 %v63_v25, %v55_v24  ;;  %v57_v28 = vld [vmem:[%s2666_s1 + $0x118] sm:$0xff]  ;;  %v54_v30 = vld [vmem:[%s2666_s1 + $0x100] sm:$0xff]  ;;  %v56_v33 = vld [vmem:[%s2666_s1 + $0x110] sm:$0xff] }
   0x8   :  { %1277 = vmatprep.subr.bf16.mxu1 %v1276_v18  ;;  %v65_v29 = vld [vmem:[%s2666_s1 + $0x158] sm:$0xff]  ;;  %v62_v32 = vld [vmem:[%s2666_s1 + $0x140] sm:$0xff]  ;;  %v64_v34 = vld [vmem:[%s2666_s1 + $0x150] sm:$0xff] }
   0x9   :  { %v1280_v31 = vpack.c.bf16 %v65_v29, %v57_v28  ;;  %v1250_v35 = vpack.c.bf16 %v62_v32, %v54_v30  ;;  %v71_v36 = vld [vmem:[%s2666_s1 + $0x188] sm:$0xff]  ;;  %v73_v38 = vld [vmem:[%s2666_s1 + $0x198] sm:$0xff]  ;;  %v1282_v39 = vpack.c.bf16 %v64_v34, %v56_v33  ;;  %v70_v42 = vld [vmem:[%s2666_s1 + $0x180] sm:$0xff] }
   0xa   :  { %1247 = vmatpush1.bf16.msra.mxu0 %v1246_v22  ;;  %v79_v37 = vld [vmem:[%s2666_s1 + $0x1c8] sm:$0xff]  ;;  %v81_v41 = vld [vmem:[%s2666_s1 + $0x1d8] sm:$0xff]  ;;  %v78_v43 = vld [vmem:[%s2666_s1 + $0x1c0] sm:$0xff] }
   0xb   :  { %1279 = vmatpush1.bf16.msra.mxu1 %v1278_v26  ;;  %1249 = vmatprep.subr.bf16.mxu0 %v1248_v27  ;;  %v1252_v40 = vpack.c.bf16 %v79_v37, %v71_v36  ;;  %v1284_v44 = vpack.c.bf16 %v81_v41, %v73_v38  ;;  %v72_v45 = vld [vmem:[%s2666_s1 + $0x190] sm:$0xff]  ;;  %v87_v47 = vld [vmem:[%s2666_s1 + $0x208] sm:$0xff]  ;;  %v89_v49 = vld [vmem:[%s2666_s1 + $0x218] sm:$0xff]  ;;  %v1254_v51 = vpack.c.bf16 %v78_v43, %v70_v42 }
   0xc   :  { %1281 = vmatprep.subr.bf16.mxu1 %v1280_v31  ;;  %v80_v46 = vld [vmem:[%s2666_s1 + $0x1d0] sm:$0xff]  ;;  %v95_v48 = vld [vmem:[%s2666_s1 + $0x248] sm:$0xff]  ;;  %v97_v50 = vld [vmem:[%s2666_s1 + $0x258] sm:$0xff] }
   0xd   :  { %v1286_v52 = vpack.c.bf16 %v80_v46, %v72_v45  ;;  %v1256_v53 = vpack.c.bf16 %v95_v48, %v87_v47  ;;  %v86_v54 = vld [vmem:[%s2666_s1 + $0x200] sm:$0xff]  ;;  %v88_v56 = vld [vmem:[%s2666_s1 + $0x210] sm:$0xff]  ;;  %v1288_v57 = vpack.c.bf16 %v97_v50, %v89_v49  ;;  %v103_v59 = vld [vmem:[%s2666_s1 + $0x288] sm:$0xff] }
   0xe   :  { %1251 = vmatpush1.bf16.msra.mxu0 %v1250_v35  ;;  %v94_v55 = vld [vmem:[%s2666_s1 + $0x240] sm:$0xff]  ;;  %v96_v58 = vld [vmem:[%s2666_s1 + $0x250] sm:$0xff]  ;;  %v111_v60 = vld [vmem:[%s2666_s1 + $0x2c8] sm:$0xff] }
   0xf   :  { %1283 = vmatpush1.bf16.msra.mxu1 %v1282_v39  ;;  %1253 = vmatprep.subr.bf16.mxu0 %v1252_v40  ;;  %v105_v61 = vld [vmem:[%s2666_s1 + $0x298] sm:$0xff]  ;;  %v1258_v63 = vpack.c.bf16 %v94_v55, %v86_v54  ;;  %v1290_v0 = vpack.c.bf16 %v96_v58, %v88_v56  ;;  %v1260_v1 = vpack.c.bf16 %v111_v60, %v103_v59  ;;  %v102_v2 = vld [vmem:[%s2666_s1 + $0x280] sm:$0xff]  ;;  %v104_v5 = vld [vmem:[%s2666_s1 + $0x290] sm:$0xff] }
  0x10   :  { %1285 = vmatprep.subr.bf16.mxu1 %v1284_v44  ;;  %v113_v62 = vld [vmem:[%s2666_s1 + $0x2d8] sm:$0xff]  ;;  %v110_v4 = vld [vmem:[%s2666_s1 + $0x2c0] sm:$0xff]  ;;  %v112_v7 = vld [vmem:[%s2666_s1 + $0x2d0] sm:$0xff] }
  0x11   :  { %v1292_v6 = vpack.c.bf16 %v113_v62, %v105_v61  ;;  %v119_v8 = vld [vmem:[%s2666_s1 + $0x308] sm:$0xff]  ;;  %v121_v10 = vld [vmem:[%s2666_s1 + $0x318] sm:$0xff]  ;;  %v1262_v12 = vpack.c.bf16 %v110_v4, %v102_v2  ;;  %v1294_v13 = vpack.c.bf16 %v112_v7, %v104_v5  ;;  %v118_v15 = vld [vmem:[%s2666_s1 + $0x300] sm:$0xff] }
  0x12   :  { %1255 = vmatpush1.bf16.msra.mxu0 %v1254_v51  ;;  %v127_v9 = vld [vmem:[%s2666_s1 + $0x348] sm:$0xff]  ;;  %v129_v11 = vld [vmem:[%s2666_s1 + $0x358] sm:$0xff]  ;;  %v126_v16 = vld [vmem:[%s2666_s1 + $0x340] sm:$0xff] }
  0x13   :  { %1287 = vmatpush1.bf16.msra.mxu1 %v1286_v52  ;;  %1257 = vmatprep.subr.bf16.mxu0 %v1256_v53  ;;  %v1264_v14 = vpack.c.bf16 %v127_v9, %v119_v8  ;;  %v120_v17 = vld [vmem:[%s2666_s1 + $0x310] sm:$0xff]  ;;  %v1296_v18 = vpack.c.bf16 %v129_v11, %v121_v10  ;;  %v135_v20 = vld [vmem:[%s2666_s1 + $0x388] sm:$0xff]  ;;  %v137_v22 = vld [vmem:[%s2666_s1 + $0x398] sm:$0xff]  ;;  %v1266_v24 = vpack.c.bf16 %v126_v16, %v118_v15 }
  0x14   :  { %1289 = vmatprep.subr.bf16.mxu1 %v1288_v57  ;;  %v128_v19 = vld [vmem:[%s2666_s1 + $0x350] sm:$0xff]  ;;  %v143_v21 = vld [vmem:[%s2666_s1 + $0x3c8] sm:$0xff]  ;;  %v145_v23 = vld [vmem:[%s2666_s1 + $0x3d8] sm:$0xff] }
  0x15   :  { %v1298_v25 = vpack.c.bf16 %v128_v19, %v120_v17  ;;  %v1268_v26 = vpack.c.bf16 %v143_v21, %v135_v20  ;;  %v134_v27 = vld [vmem:[%s2666_s1 + $0x380] sm:$0xff]  ;;  %v136_v29 = vld [vmem:[%s2666_s1 + $0x390] sm:$0xff]  ;;  %v1300_v30 = vpack.c.bf16 %v145_v23, %v137_v22  ;;  %v27_v32 = vld [vmem:[%s2666_s1 + $0x28] sm:$0xff] }
  0x16   :  { %1259 = vmatpush1.bf16.msra.mxu0 %v1258_v63  ;;  %v142_v28 = vld [vmem:[%s2666_s1 + $0x3c0] sm:$0xff]  ;;  %v144_v31 = vld [vmem:[%s2666_s1 + $0x3d0] sm:$0xff]  ;;  %v35_v33 = vld [vmem:[%s2666_s1 + $0x68] sm:$0xff] }
  0x17   :  { %1291 = vmatpush1.bf16.msra.mxu1 %v1290_v0  ;;  %1261 = vmatprep.subr.bf16.mxu0 %v1260_v1  ;;  %v29_v34 = vld [vmem:[%s2666_s1 + $0x38] sm:$0xff]  ;;  %v1270_v36 = vpack.c.bf16 %v142_v28, %v134_v27  ;;  %v1302_v37 = vpack.c.bf16 %v144_v31, %v136_v29  ;;  %v1304_v38 = vpack.c.bf16 %v35_v33, %v27_v32  ;;  %v26_v39 = vld [vmem:[%s2666_s1 + $0x20] sm:$0xff]  ;;  %v28_v42 = vld [vmem:[%s2666_s1 + $0x30] sm:$0xff] }
  0x18   :  { %1293 = vmatprep.subr.bf16.mxu1 %v1292_v6  ;;  %v37_v35 = vld [vmem:[%s2666_s1 + $0x78] sm:$0xff]  ;;  %v34_v40 = vld [vmem:[%s2666_s1 + $0x60] sm:$0xff]  ;;  %v36_v43 = vld [vmem:[%s2666_s1 + $0x70] sm:$0xff] }
  0x19   :  { %v1336_v41 = vpack.c.bf16 %v37_v35, %v29_v34  ;;  %v43_v44 = vld [vmem:[%s2666_s1 + $0xa8] sm:$0xff]  ;;  %v1789_v46 = vld [vmem:[%s2667_s0] sm:$0xff]  ;;  %v1306_v47 = vpack.c.bf16 %v34_v40, %v26_v39  ;;  %v45_v48 = vld [vmem:[%s2666_s1 + $0xb8] sm:$0xff]  ;;  %v1338_v50 = vpack.c.bf16 %v36_v43, %v28_v42 }
  0x1a   :  { %1263 = vmatpush1.bf16.msra.mxu0 %v1262_v12  ;;  %v51_v45 = vld [vmem:[%s2666_s1 + $0xe8] sm:$0xff]  ;;  %v53_v49 = vld [vmem:[%s2666_s1 + $0xf8] sm:$0xff]  ;;  %v42_v51 = vld [vmem:[%s2666_s1 + $0xa0] sm:$0xff] }
  0x1b   :  { %1295 = vmatpush1.bf16.msra.mxu1 %v1294_v13  ;;  %1265 = vmatprep.subr.bf16.mxu0 %v1264_v14  ;;  %v50_v52 = vld [vmem:[%s2666_s1 + $0xe0] sm:$0xff]  ;;  %v44_v53 = vld [vmem:[%s2666_s1 + $0xb0] sm:$0xff]  ;;  %v1308_v54 = vpack.c.bf16 %v51_v45, %v43_v44  ;;  %v59_v56 = vld [vmem:[%s2666_s1 + $0x128] sm:$0xff]  ;;  %v1340_v58 = vpack.c.bf16 %v53_v49, %v45_v48 }
  0x1c   :  { %1297 = vmatprep.subr.bf16.mxu1 %v1296_v18  ;;  %v52_v55 = vld [vmem:[%s2666_s1 + $0xf0] sm:$0xff]  ;;  %v67_v57 = vld [vmem:[%s2666_s1 + $0x168] sm:$0xff]  ;;  %v61_v59 = vld [vmem:[%s2666_s1 + $0x138] sm:$0xff]  ;;  %v1310_v62 = vpack.c.bf16 %v50_v52, %v42_v51 }
  0x1d   :  { %v69_v60 = vld [vmem:[%s2666_s1 + $0x178] sm:$0xff]  ;;  %v1826_v61 = vld [vmem:[%s2667_s0 + $0x8] sm:$0xff]  ;;  %v1342_v63 = vpack.c.bf16 %v52_v55, %v44_v53  ;;  %v1312_v0 = vpack.c.bf16 %v67_v57, %v59_v56  ;;  %v58_v1 = vld [vmem:[%s2666_s1 + $0x120] sm:$0xff] }
  0x1e   :  { %1267 = vmatpush1.bf16.msra.mxu0 %v1266_v24  ;;  %v66_v2 = vld [vmem:[%s2666_s1 + $0x160] sm:$0xff]  ;;  %v60_v4 = vld [vmem:[%s2666_s1 + $0x130] sm:$0xff]  ;;  %v1344_v5 = vpack.c.bf16 %v69_v60, %v61_v59  ;;  %v75_v7 = vld [vmem:[%s2666_s1 + $0x1a8] sm:$0xff] }
  0x1f   :  { %1299 = vmatpush1.bf16.msra.mxu1 %v1298_v25  ;;  %1269 = vmatprep.subr.bf16.mxu0 %v1268_v26  ;;  %v68_v6 = vld [vmem:[%s2666_s1 + $0x170] sm:$0xff]  ;;  %v83_v8 = vld [vmem:[%s2666_s1 + $0x1e8] sm:$0xff]  ;;  %v77_v9 = vld [vmem:[%s2666_s1 + $0x1b8] sm:$0xff]  ;;  %v1314_v11 = vpack.c.bf16 %v66_v2, %v58_v1 }
  0x20   :  { %1301 = vmatprep.subr.bf16.mxu1 %v1300_v30  ;;  %v85_v10 = vld [vmem:[%s2666_s1 + $0x1f8] sm:$0xff]  ;;  %v1346_v12 = vpack.c.bf16 %v68_v6, %v60_v4  ;;  %v1316_v13 = vpack.c.bf16 %v83_v8, %v75_v7  ;;  %v74_v14 = vld [vmem:[%s2666_s1 + $0x1a0] sm:$0xff]  ;;  %v76_v16 = vld [vmem:[%s2666_s1 + $0x1b0] sm:$0xff] }
  0x21   :  { %v82_v15 = vld [vmem:[%s2666_s1 + $0x1e0] sm:$0xff]  ;;  %v1348_v17 = vpack.c.bf16 %v85_v10, %v77_v9  ;;  %v84_v18 = vld [vmem:[%s2666_s1 + $0x1f0] sm:$0xff]  ;;  %v91_v19 = vld [vmem:[%s2666_s1 + $0x228] sm:$0xff] }
  0x22   :  { %1271 = vmatpush1.bf16.msra.mxu0 %v1270_v36  ;;  %v99_v20 = vld [vmem:[%s2666_s1 + $0x268] sm:$0xff]  ;;  %v93_v21 = vld [vmem:[%s2666_s1 + $0x238] sm:$0xff]  ;;  %v1318_v23 = vpack.c.bf16 %v82_v15, %v74_v14  ;;  %v1350_v24 = vpack.c.bf16 %v84_v18, %v76_v16  ;;  %v90_v26 = vld [vmem:[%s2666_s1 + $0x220] sm:$0xff] }
  0x23   :  { %1303 = vmatpush1.bf16.msra.mxu1 %v1302_v37  ;;  %1305 = vmatprep.subr.bf16.mxu0 %v1304_v38  ;;  %v101_v22 = vld [vmem:[%s2666_s1 + $0x278] sm:$0xff]  ;;  %v1320_v25 = vpack.c.bf16 %v99_v20, %v91_v19  ;;  %v98_v27 = vld [vmem:[%s2666_s1 + $0x260] sm:$0xff]  ;;  %v92_v28 = vld [vmem:[%s2666_s1 + $0x230] sm:$0xff] }
  0x24   :  { %1337 = vmatprep.subr.bf16.mxu1 %v1336_v41  ;;  %v1352_v29 = vpack.c.bf16 %v101_v22, %v93_v21  ;;  %v100_v30 = vld [vmem:[%s2666_s1 + $0x270] sm:$0xff]  ;;  %v107_v31 = vld [vmem:[%s2666_s1 + $0x2a8] sm:$0xff]  ;;  %v109_v33 = vld [vmem:[%s2666_s1 + $0x2b8] sm:$0xff]  ;;  %v1322_v35 = vpack.c.bf16 %v98_v27, %v90_v26 }
  0x25   :  { %257 = vmatmul.mubr.f32.vlgmr.msra.gmra.mrb[0].mxu0 %v1789_v46  ;;  %v115_v32 = vld [vmem:[%s2666_s1 + $0x2e8] sm:$0xff]  ;;  %v117_v34 = vld [vmem:[%s2666_s1 + $0x2f8] sm:$0xff]  ;;  %v1354_v36 = vpack.c.bf16 %v100_v30, %v92_v28  ;;  %v106_v38 = vld [vmem:[%s2666_s1 + $0x2a0] sm:$0xff] }
  0x26   :  { %334 = vmatmul.mubr.f32.vlgmr.msra.gmra.mrb[0].mxu1 %v1789_v46  ;;  %1307 = vmatpush1.bf16.msra.mxu0 %v1306_v47  ;;  %v1324_v37 = vpack.c.bf16 %v115_v32, %v107_v31  ;;  %v114_v39 = vld [vmem:[%s2666_s1 + $0x2e0] sm:$0xff]  ;;  %v108_v40 = vld [vmem:[%s2666_s1 + $0x2b0] sm:$0xff]  ;;  %v1356_v41 = vpack.c.bf16 %v117_v34, %v109_v33  ;;  %v123_v43 = vld [vmem:[%s2666_s1 + $0x328] sm:$0xff] }
  0x27   :  { %1339 = vmatpush1.bf16.msra.mxu1 %v1338_v50  ;;  %262 = vmatprep.mubr.f32.mxu0 %v1531_v3  ;;  %v116_v42 = vld [vmem:[%s2666_s1 + $0x2f0] sm:$0xff]  ;;  %v131_v44 = vld [vmem:[%s2666_s1 + $0x368] sm:$0xff]  ;;  %v125_v45 = vld [vmem:[%s2666_s1 + $0x338] sm:$0xff]  ;;  %v1326_v48 = vpack.c.bf16 %v114_v39, %v106_v38 }
  0x28   :  { %339 = vmatprep.mubr.f32.mxu1 %v1531_v3  ;;  %1309 = vmatprep.subr.bf16.mxu0 %v1308_v54  ;;  %v133_v47 = vld [vmem:[%s2666_s1 + $0x378] sm:$0xff]  ;;  %v1358_v49 = vpack.c.bf16 %v116_v42, %v108_v40  ;;  %v1328_v50 = vpack.c.bf16 %v131_v44, %v123_v43  ;;  %v122_v51 = vld [vmem:[%s2666_s1 + $0x320] sm:$0xff]  ;;  %v124_v53 = vld [vmem:[%s2666_s1 + $0x330] sm:$0xff] }
  0x29   :  { %263 = vmatmul.mubr.f32.gmra.mrb[2].mxu0 %v1826_v61  ;;  %1341 = vmatprep.subr.bf16.mxu1 %v1340_v58  ;;  %v130_v52 = vld [vmem:[%s2666_s1 + $0x360] sm:$0xff]  ;;  %v1360_v54 = vpack.c.bf16 %v133_v47, %v125_v45  ;;  %v132_v55 = vld [vmem:[%s2666_s1 + $0x370] sm:$0xff]  ;;  %v139_v56 = vld [vmem:[%s2666_s1 + $0x3a8] sm:$0xff] }
  0x2a   :  { %340 = vmatmul.mubr.f32.gmra.mrb[2].mxu1 %v1826_v61  ;;  %1311 = vmatpush1.bf16.msra.mxu0 %v1310_v62  ;;  %v147_v57 = vld [vmem:[%s2666_s1 + $0x3e8] sm:$0xff]  ;;  %v141_v58 = vld [vmem:[%s2666_s1 + $0x3b8] sm:$0xff]  ;;  %v1330_v60 = vpack.c.bf16 %v130_v52, %v122_v51  ;;  %v1362_v62 = vpack.c.bf16 %v132_v55, %v124_v53  ;;  %v146_v1 = vld [vmem:[%s2666_s1 + $0x3e0] sm:$0xff] }
  0x2b   :  { %1343 = vmatpush1.bf16.msra.mxu1 %v1342_v63  ;;  %1313 = vmatprep.subr.bf16.mxu0 %v1312_v0  ;;  %v149_v59 = vld [vmem:[%s2666_s1 + $0x3f8] sm:$0xff]  ;;  %v1332_v63 = vpack.c.bf16 %v147_v57, %v139_v56  ;;  %v138_v0 = vld [vmem:[%s2666_s1 + $0x3a0] sm:$0xff]  ;;  %v140_v4 = vld [vmem:[%s2666_s1 + $0x3b0] sm:$0xff] }
  0x2c   :  { %1345 = vmatprep.subr.bf16.mxu1 %v1344_v5  ;;  %410 = vmatprep.mubr.f32.mxu0 %v1531_v3  ;;  %v1364_v2 = vpack.c.bf16 %v149_v59, %v141_v58  ;;  %v148_v5 = vld [vmem:[%s2666_s1 + $0x3f0] sm:$0xff]  ;;  %v1334_v6 = vpack.c.bf16 %v146_v1, %v138_v0  ;;  %v660_v8 = vld [vmem:[%s2668_s3 + $0x80] sm:$0xff]  ;;  %v661_v9 = vld [vmem:[%s2668_s3 + $0x88] sm:$0xff] }
  0x2d   :  { %487 = vmatprep.mubr.f32.mxu1 %v1531_v3  ;;  %v1366_v7 = vpack.c.bf16 %v148_v5, %v140_v4  ;;  %v1368_v10 = vpack.c.bf16 %v661_v9, %v660_v8  ;;  %v676_v14 = vld [vmem:[%s2668_s3 + $0x100] sm:$0xff]  ;;  %v677_v15 = vld [vmem:[%s2668_s3 + $0x108] sm:$0xff]  ;;  %v663_v18 = vld [vmem:[%s2668_s3 + $0x98] sm:$0xff] }
  0x2e   :  { %1315 = vmatpush1.bf16.msra.mxu0 %v1314_v11  ;;  %v645_v11 = vld [vmem:[%s2668_s3 + $0x8] sm:$0xff]  ;;  %v1402_v16 = vpack.c.bf16 %v677_v15, %v676_v14  ;;  %v694_v19 = vld [vmem:[%s2668_s3 + $0x190] sm:$0xff]  ;;  %v695_v21 = vld [vmem:[%s2668_s3 + $0x198] sm:$0xff] }
  0x2f   :  { %1347 = vmatpush1.bf16.msra.mxu1 %v1346_v12  ;;  %1317 = vmatprep.subr.bf16.mxu0 %v1316_v13  ;;  %v1404_v22 = vpack.c.bf16 %v695_v21, %v694_v19  ;;  %v679_v27 = vld [vmem:[%s2668_s3 + $0x118] sm:$0xff]  ;;  %v665_v30 = vld [vmem:[%s2668_s3 + $0xa8] sm:$0xff]  ;;  %v696_v31 = vld [vmem:[%s2668_s3 + $0x1a0] sm:$0xff] }
  0x30   :  { %1349 = vmatprep.subr.bf16.mxu1 %v1348_v17  ;;  %v662_v17 = vld [vmem:[%s2668_s3 + $0x90] sm:$0xff]  ;;  %v697_v33 = vld [vmem:[%s2668_s3 + $0x1a8] sm:$0xff]  ;;  %v648_v34 = vld [vmem:[%s2668_s3 + $0x20] sm:$0xff] }
  0x31   :  { %v1372_v20 = vpack.c.bf16 %v663_v18, %v662_v17  ;;  %v680_v38 = vld [vmem:[%s2668_s3 + $0x120] sm:$0xff]  ;;  %v681_v39 = vld [vmem:[%s2668_s3 + $0x128] sm:$0xff]  ;;  %v667_v42 = vld [vmem:[%s2668_s3 + $0xb8] sm:$0xff] }
  0x32   :  { %1319 = vmatpush1.bf16.msra.mxu0 %v1318_v23  ;;  %v646_v23 = vld [vmem:[%s2668_s3 + $0x10] sm:$0xff]  ;;  %v1410_v40 = vpack.c.bf16 %v681_v39, %v680_v38  ;;  %v699_v45 = vld [vmem:[%s2668_s3 + $0x1b8] sm:$0xff]  ;;  %v669_v55 = vld [vmem:[%s2668_s3 + $0xc8] sm:$0xff] }
  0x33   :  { %1351 = vmatpush1.bf16.msra.mxu1 %v1350_v24  ;;  %1321 = vmatprep.subr.bf16.mxu0 %v1320_v25  ;;  %v647_v24 = vld [vmem:[%s2668_s3 + $0x18] sm:$0xff]  ;;  %v678_v25 = vld [vmem:[%s2668_s3 + $0x110] sm:$0xff]  ;;  %v700_v56 = vld [vmem:[%s2668_s3 + $0x1c0] sm:$0xff] }
  0x34   :  { %1353 = vmatprep.subr.bf16.mxu1 %v1352_v29  ;;  %v1374_v26 = vpack.c.bf16 %v647_v24, %v646_v23  ;;  %v1406_v28 = vpack.c.bf16 %v679_v27, %v678_v25  ;;  %v664_v29 = vld [vmem:[%s2668_s3 + $0xa0] sm:$0xff]  ;;  %v698_v43 = vld [vmem:[%s2668_s3 + $0x1b0] sm:$0xff]  ;;  %v683_v52 = vld [vmem:[%s2668_s3 + $0x138] sm:$0xff] }
  0x35   :  { %v1376_v32 = vpack.c.bf16 %v665_v30, %v664_v29  ;;  %v650_v47 = vld [vmem:[%s2668_s3 + $0x30] sm:$0xff]  ;;  %v701_v58 = vld [vmem:[%s2668_s3 + $0x1c8] sm:$0xff]  ;;  %v652_v59 = vld [vmem:[%s2668_s3 + $0x40] sm:$0xff] }
  0x36   :  { %1323 = vmatpush1.bf16.msra.mxu0 %v1322_v35  ;;  %v649_v35 = vld [vmem:[%s2668_s3 + $0x28] sm:$0xff]  ;;  %v682_v51 = vld [vmem:[%s2668_s3 + $0x130] sm:$0xff]  ;;  %v684_v0 = vld [vmem:[%s2668_s3 + $0x140] sm:$0xff] }
  0x37   :  { %1355 = vmatpush1.bf16.msra.mxu1 %v1354_v36  ;;  %1325 = vmatprep.subr.bf16.mxu0 %v1324_v37  ;;  %v1408_v36 = vpack.c.bf16 %v697_v33, %v696_v31  ;;  %v1378_v37 = vpack.c.bf16 %v649_v35, %v648_v34  ;;  %v1414_v53 = vpack.c.bf16 %v683_v52, %v682_v51  ;;  %v685_v1 = vld [vmem:[%s2668_s3 + $0x148] sm:$0xff]  ;;  %v670_v4 = vld [vmem:[%s2668_s3 + $0xd0] sm:$0xff]  ;;  %v671_v5 = vld [vmem:[%s2668_s3 + $0xd8] sm:$0xff] }
  0x38   :  { %1357 = vmatprep.subr.bf16.mxu1 %v1356_v41  ;;  %v666_v41 = vld [vmem:[%s2668_s3 + $0xb0] sm:$0xff]  ;;  %v703_v8 = vld [vmem:[%s2668_s3 + $0x1d8] sm:$0xff]  ;;  %v673_v14 = vld [vmem:[%s2668_s3 + $0xe8] sm:$0xff] }
  0x39   :  { %v1380_v44 = vpack.c.bf16 %v667_v42, %v666_v41  ;;  %v654_v9 = vld [vmem:[%s2668_s3 + $0x50] sm:$0xff]  ;;  %v704_v15 = vld [vmem:[%s2668_s3 + $0x1e0] sm:$0xff]  ;;  %v705_v17 = vld [vmem:[%s2668_s3 + $0x1e8] sm:$0xff] }
  0x3a   :  { %1327 = vmatpush1.bf16.msra.mxu0 %v1326_v48  ;;  %v651_v48 = vld [vmem:[%s2668_s3 + $0x38] sm:$0xff]  ;;  %v656_v18 = vld [vmem:[%s2668_s3 + $0x60] sm:$0xff]  ;;  %v657_v19 = vld [vmem:[%s2668_s3 + $0x68] sm:$0xff] }
  0x3b   :  { %1359 = vmatpush1.bf16.msra.mxu1 %v1358_v49  ;;  %1329 = vmatprep.subr.bf16.mxu0 %v1328_v50  ;;  %v1412_v49 = vpack.c.bf16 %v699_v45, %v698_v43  ;;  %v1382_v50 = vpack.c.bf16 %v651_v48, %v650_v47  ;;  %v1394_v21 = vpack.c.bf16 %v657_v19, %v656_v18  ;;  %v689_v23 = vld [vmem:[%s2668_s3 + $0x168] sm:$0xff]  ;;  %v674_v25 = vld [vmem:[%s2668_s3 + $0xf0] sm:$0xff]  ;;  %v707_v29 = vld [vmem:[%s2668_s3 + $0x1f8] sm:$0xff]  ;;  %v152_v43 = vlaneseq }
  0x3c   :  { %1361 = vmatprep.subr.bf16.mxu1 %v1360_v54  ;;  %v668_v54 = vld [vmem:[%s2668_s3 + $0xc0] sm:$0xff]  ;;  %v706_v27 = vld [vmem:[%s2668_s3 + $0x1f0] sm:$0xff]  ;;  %v659_v31 = vld [vmem:[%s2668_s3 + $0x78] sm:$0xff] }
  0x3d   :  { %v1384_v57 = vpack.c.bf16 %v669_v55, %v668_v54  ;;  %v658_v30 = vld [vmem:[%s2668_s3 + $0x70] sm:$0xff]  ;;  %v691_v35 = vld [vmem:[%s2668_s3 + $0x178] sm:$0xff]  ;;  %v725_v38 = vld [vmem:[%s2668_s3 + $0x288] sm:$0xff] }
  0x3e   :  { %1331 = vmatpush1.bf16.msra.mxu0 %v1330_v60  ;;  %v653_v60 = vld [vmem:[%s2668_s3 + $0x48] sm:$0xff]  ;;  %v1398_v33 = vpack.c.bf16 %v659_v31, %v658_v30  ;;  %v690_v34 = vld [vmem:[%s2668_s3 + $0x170] sm:$0xff]  ;;  %v756_v39 = vld [vmem:[%s2668_s3 + $0x380] sm:$0xff] }
  0x3f   :  { %1363 = vmatpush1.bf16.msra.mxu1 %v1362_v62  ;;  %1333 = vmatprep.subr.bf16.mxu0 %v1332_v63  ;;  %v1416_v62 = vpack.c.bf16 %v701_v58, %v700_v56  ;;  %v1386_v63 = vpack.c.bf16 %v653_v60, %v652_v59  ;;  %v757_v41 = vld [vmem:[%s2668_s3 + $0x388] sm:$0xff]  ;;  %v2182_v47 = vld [vmem:[%s2669_s2] sm:$0xff] }
  0x40   :  { %1365 = vmatprep.subr.bf16.mxu1 %v1364_v2  ;;  %v1418_v2 = vpack.c.bf16 %v685_v1, %v684_v0  ;;  %v1464_v42 = vpack.c.bf16 %v757_v41, %v756_v39 }
  0x42   :  { %1335 = vmatpush1.bf16.msra.mxu0 %v1334_v6  ;;  %v702_v6 = vld [vmem:[%s2668_s3 + $0x1d0] sm:$0xff] }
  0x43   :  { %1367 = vmatpush1.bf16.msra.mxu1 %v1366_v7  ;;  %1369 = vmatprep.subr.bf16.mxu0 %v1368_v10  ;;  %v1388_v7 = vpack.c.bf16 %v671_v5, %v670_v4  ;;  %v1420_v10 = vpack.c.bf16 %v703_v8, %v702_v6 }
  0x45   :  { %411 = vmatmul.mubr.f32.vlgmr.msra.gmra.mrb[4].mxu0 %v1789_v46 }
  0x46   :  { %488 = vmatmul.mubr.f32.vlgmr.msra.gmra.mrb[4].mxu1 %v1789_v46  ;;  %416 = vmatprep.mubr.f32.mxu0 %v1531_v3  ;;  %v692_v46 = vld [vmem:[%s2668_s3 + $0x180] sm:$0xff] }
  0x47   :  { %493 = vmatprep.mubr.f32.mxu1 %v1531_v3  ;;  %v693_v3 = vld [vmem:[%s2668_s3 + $0x188] sm:$0xff] }
  0x48   :  { %v1400_v12 = vpack.c.bf16 %v693_v3, %v692_v46  ;;  %v655_v46 = vld [vmem:[%s2668_s3 + $0x58] sm:$0xff] }
  0x49   :  { %417 = vmatmul.mubr.f32.gmra.mrb[6].mxu0 %v1826_v61  ;;  %v1390_v3 = vpack.c.bf16 %v655_v46, %v654_v9 }
  0x4a   :  { %494 = vmatmul.mubr.f32.gmra.mrb[6].mxu1 %v1826_v61  ;;  %v644_v61 = vld [vmem:[%s2668_s3] sm:$0xff]  ;;  %1401 = vmatprep.subr.bf16.mxu1 %v1400_v12 }
  0x4b   :  { %v1370_v13 = vpack.c.bf16 %v645_v11, %v644_v61  ;;  %1403 = vmatpush3.bf16.msra.mxu1 %v1402_v16  ;;  %v686_v61 = vld [vmem:[%s2668_s3 + $0x150] sm:$0xff]  ;;  %v687_v11 = vld [vmem:[%s2668_s3 + $0x158] sm:$0xff] }
  0x4c   :  { %1405 = vmatprep.subr.bf16.mxu1 %v1404_v22  ;;  %v1422_v12 = vpack.c.bf16 %v687_v11, %v686_v61  ;;  %v688_v22 = vld [vmem:[%s2668_s3 + $0x160] sm:$0xff] }
  0x4d   :  { %1371 = vmatpush3.bf16.msra.mxu0 %v1370_v13  ;;  %v672_v13 = vld [vmem:[%s2668_s3 + $0xe0] sm:$0xff]  ;;  %v1426_v24 = vpack.c.bf16 %v689_v23, %v688_v22 }
  0x4e   :  { %1373 = vmatprep.subr.bf16.mxu0 %v1372_v20  ;;  %v1392_v16 = vpack.c.bf16 %v673_v14, %v672_v13  ;;  %v1424_v20 = vpack.c.bf16 %v705_v17, %v704_v15 }
  0x4f   :  { %1407 = vmatpush3.bf16.msra.mxu1 %v1406_v28 }
  0x50   :  { %1409 = vmatprep.subr.bf16.mxu1 %v1408_v36  ;;  %v1430_v36 = vpack.c.bf16 %v691_v35, %v690_v34 }
  0x51   :  { %1375 = vmatpush3.bf16.msra.mxu0 %v1374_v26  ;;  %v675_v26 = vld [vmem:[%s2668_s3 + $0xf8] sm:$0xff] }
  0x52   :  { %1377 = vmatprep.subr.bf16.mxu0 %v1376_v32  ;;  %v1396_v28 = vpack.c.bf16 %v675_v26, %v674_v25  ;;  %v1428_v32 = vpack.c.bf16 %v707_v29, %v706_v27 }
  0x53   :  { %1411 = vmatpush3.bf16.msra.mxu1 %v1410_v40 }
  0x54   :  { %1413 = vmatprep.subr.bf16.mxu1 %v1412_v49 }
  0x55   :  { %1379 = vmatpush3.bf16.msra.mxu0 %v1378_v37  ;;  %v724_v37 = vld [vmem:[%s2668_s3 + $0x280] sm:$0xff] }
  0x56   :  { %1381 = vmatprep.subr.bf16.mxu0 %v1380_v44  ;;  %v1432_v40 = vpack.c.bf16 %v725_v38, %v724_v37  ;;  %v2176_v44 = vshrl.u32 %v152_v43, 7 }
  0x57   :  { %1415 = vmatpush3.bf16.msra.mxu1 %v1414_v53 }
  0x58   :  { %1417 = vmatprep.subr.bf16.mxu1 %v1416_v62  ;;  %v154_v45 = vsub.s32 0, %v2176_v44  ;;  %v162_v48 = vsub.s32 2, %v2176_v44  ;;  %v158_v49 = vsub.s32 1, %v2176_v44 }
  0x59   :  { %1383 = vmatpush3.bf16.msra.mxu0 %v1382_v50  ;;  %v166_v50 = vsub.s32 3, %v2176_v44 }
  0x5a   :  { %1385 = vmatprep.subr.bf16.mxu0 %v1384_v57  ;;  %v155_v51 = vrot.slane %v2182_v47, %v154_v45  ;;  %v163_v52 = vrot.slane %v2182_v47, %v162_v48  ;;  %v159_v53 = vrot.slane %v2182_v47, %v158_v49  ;;  %v170_v49 = vsub.s32 4, %v2176_v44 }
  0x5b   :  { %1419 = vmatpush3.bf16.msra.mxu1 %v1418_v2  ;;  %v167_v54 = vrot.slane %v2182_v47, %v166_v50  ;;  %v178_v50 = vsub.s32 6, %v2176_v44 }
  0x5c   :  { %1421 = vmatprep.subr.bf16.mxu1 %v1420_v10 }
  0x5d   :  { %1387 = vmatpush3.bf16.msra.mxu0 %v1386_v63 }
  0x5e   :  { %1389 = vmatprep.subr.bf16.mxu0 %v1388_v7 }
  0x5f   :  { %1423 = vmatpush3.bf16.msra.mxu1 %v1422_v12 }
  0x60   :  { %1425 = vmatprep.subr.bf16.mxu1 %v1424_v20 }
  0x61   :  { %1391 = vmatpush3.bf16.msra.mxu0 %v1390_v3 }
  0x62   :  { %1393 = vmatprep.subr.bf16.mxu0 %v1392_v16 }
  0x63   :  { %1427 = vmatpush3.bf16.msra.mxu1 %v1426_v24 }
  0x64   :  { %1429 = vmatprep.subr.bf16.mxu1 %v1428_v32 }
  0x65   :  { %1395 = vmatpush3.bf16.msra.mxu0 %v1394_v21 }
  0x66   :  { %1397 = vmatprep.subr.bf16.mxu0 %v1396_v28 }
  0x67   :  { %1431 = vmatpush3.bf16.msra.mxu1 %v1430_v36 }
  0x68   :  { %1465 = vmatprep.subr.bf16.mxu1 %v1464_v42 }
  0x69   :  { %1399 = vmatpush3.bf16.msra.mxu0 %v1398_v33 }
  0x6a   :  { %1433 = vmatprep.subr.bf16.mxu0 %v1432_v40 }
  0xf8   :  { %v258_v55 = vpop.f32.mrb[0].mxu0 }
  0xf9   :  { %v2191_v56 = vadd.f32 %v258_v55, %v155_v51  ;;  %v335_v57 = vpop.f32.mrb[0].mxu1  ;;  %v260_v58 = vpop.f32.mrb[1].mxu0  ;;  %v2256_v55 = vld [vmem:[%s2668_s3 + $0x300] sm:$0xff] }
  0xfa   :  { %v2193_v59 = vadd.f32 %v335_v57, %v163_v52  ;;  %v2195_v60 = vadd.f32 %v260_v58, %v159_v53  ;;  %v337_v62 = vpop.f32.mrb[1].mxu1  ;;  %v2261_v57 = vld [vmem:[%s2668_s3 + $0x308] sm:$0xff]  ;;  %v2266_v58 = vld [vmem:[%s2668_s3 + $0x290] sm:$0xff] }
  0xfb   :  { %v500_v63 = vmul.f32 %v2191_v56, %v2191_v56  ;;  %v2199_v0 = vadd.f32 %v337_v62, %v167_v54  ;;  %v2276_v62 = vld [vmem:[%s2668_s3 + $0x390] sm:$0xff] }
  0xfc   :  { %v502_v1 = vmul.f32 %v2193_v59, %v2193_v59  ;;  %v501_v2 = vmul.f32 %v2195_v60, %v2195_v60  ;;  %v264_v4 = vpop.f32.mrb[2].mxu0 }
  0xfd   :  { %v516_v5 = vmul.f32 %v500_v63, %v2191_v56  ;;  %v503_v6 = vmul.f32 %v2199_v0, %v2199_v0  ;;  %v2208_v7 = vadd.f32 %v264_v4, %v155_v51  ;;  %v341_v8 = vpop.f32.mrb[2].mxu1  ;;  %v266_v9 = vpop.f32.mrb[3].mxu0  ;;  %v2244_v51 = vld [vmem:[%s2668_s3 + $0x200] sm:$0xff]  ;;  %v2281_v63 = vld [vmem:[%s2668_s3 + $0x398] sm:$0xff]  ;;  %v2296_v4 = vld [vmem:[%s2668_s3 + $0x310] sm:$0xff] }
  0xfe   :  { %v518_v46 = vmul.f32 %v502_v1, %v2193_v59  ;;  %v517_v10 = vmul.f32 %v501_v2, %v2195_v60  ;;  %v2212_v3 = vadd.f32 %v341_v8, %v163_v52  ;;  %v2214_v61 = vadd.f32 %v266_v9, %v159_v53  ;;  %v343_v11 = vpop.f32.mrb[3].mxu1  ;;  %v2249_v52 = vld [vmem:[%s2668_s3 + $0x208] sm:$0xff]  ;;  %v2286_v1 = vld [vmem:[%s2668_s3 + $0x210] sm:$0xff]  ;;  %v2291_v2 = vld [vmem:[%s2668_s3 + $0x218] sm:$0xff] }
  0xff   :  { %v532_v12 = vmul.f32 0.044715, %v516_v5  ;;  %v519_v13 = vmul.f32 %v503_v6, %v2199_v0  ;;  %v508_v14 = vmul.f32 %v2208_v7, %v2208_v7  ;;  %v2219_v15 = vadd.f32 %v343_v11, %v167_v54  ;;  %v2301_v5 = vld [vmem:[%s2668_s3 + $0x318] sm:$0xff]  ;;  %v2322_v11 = vld [vmem:[%s2668_s3 + $0x3a0] sm:$0xff] }
 0x100   :  { %v534_v16 = vmul.f32 0.044715, %v518_v46  ;;  %v533_v17 = vmul.f32 0.044715, %v517_v10  ;;  %v510_v18 = vmul.f32 %v2212_v3, %v2212_v3  ;;  %v509_v19 = vmul.f32 %v2214_v61, %v2214_v61  ;;  %v2312_v46 = vld [vmem:[%s2668_s3 + $0x2a0] sm:$0xff]  ;;  %v2317_v10 = vld [vmem:[%s2668_s3 + $0x2a8] sm:$0xff] }
 0x101   :  { %v548_v20 = vadd.f32 %v532_v12, %v2191_v56  ;;  %v535_v21 = vmul.f32 0.044715, %v519_v13  ;;  %v524_v22 = vmul.f32 %v508_v14, %v2208_v7  ;;  %v511_v23 = vmul.f32 %v2219_v15, %v2219_v15 }
 0x102   :  { %v550_v24 = vadd.f32 %v534_v16, %v2193_v59  ;;  %v549_v25 = vadd.f32 %v533_v17, %v2195_v60  ;;  %v526_v26 = vmul.f32 %v510_v18, %v2212_v3  ;;  %v525_v27 = vmul.f32 %v509_v19, %v2214_v61  ;;  %v2335_v18 = vld [vmem:[%s2668_s3 + $0x3a8] sm:$0xff]  ;;  %v2340_v19 = vld [vmem:[%s2668_s3 + $0x220] sm:$0xff] }
 0x103   :  { %v564_v28 = vmul.f32 0.7978846, %v548_v20  ;;  %v551_v29 = vadd.f32 %v535_v21, %v2199_v0  ;;  %v540_v30 = vmul.f32 0.044715, %v524_v22  ;;  %v527_v31 = vmul.f32 %v511_v23, %v2219_v15  ;;  %v2345_v20 = vld [vmem:[%s2668_s3 + $0x228] sm:$0xff] }
 0x104   :  { %v566_v32 = vmul.f32 0.7978846, %v550_v24  ;;  %v565_v33 = vmul.f32 0.7978846, %v549_v25  ;;  %v542_v34 = vmul.f32 0.044715, %v526_v26  ;;  %v2304_v8 = vrot.slane %v2182_v47, %v170_v49 }
 0x105   :  { %1497 = vtanh.f32 %v564_v28  ;;  %v567_v35 = vmul.f32 0.7978846, %v551_v29  ;;  %v556_v36 = vadd.f32 %v540_v30, %v2208_v7  ;;  %v541_v37 = vmul.f32 0.044715, %v525_v27  ;;  %v2356_v25 = vld [vmem:[%s2668_s3 + $0x320] sm:$0xff]  ;;  %v2361_v26 = vld [vmem:[%s2668_s3 + $0x328] sm:$0xff] }
 0x106   :  { %1499 = vtanh.f32 %v566_v32  ;;  %v558_v38 = vadd.f32 %v542_v34, %v2212_v3  ;;  %v543_v39 = vmul.f32 0.044715, %v527_v31  ;;  %v174_v53 = vsub.s32 5, %v2176_v44  ;;  %v2366_v27 = vld [vmem:[%s2668_s3 + $0x2b0] sm:$0xff] }
 0x107   :  { %v572_v40 = vmul.f32 0.7978846, %v556_v36  ;;  %v557_v41 = vadd.f32 %v541_v37, %v2214_v61  ;;  %1501 = vtanh.f32 %v565_v33  ;;  %v182_v54 = vsub.s32 7, %v2176_v44  ;;  %v2271_v44 = vld [vmem:[%s2668_s3 + $0x298] sm:$0xff]  ;;  %v2382_v34 = vld [vmem:[%s2668_s3 + $0x3b0] sm:$0xff] }
 0x108   :  { %v574_v42 = vmul.f32 0.7978846, %v558_v38  ;;  %v559_v43 = vadd.f32 %v543_v39, %v2219_v15  ;;  %1503 = vtanh.f32 %v567_v35  ;;  %v2307_v9 = vrot.slane %v2182_v47, %v178_v50  ;;  %v2377_v33 = vld [vmem:[%s2668_s3 + $0x2b8] sm:$0xff] }
 0x109   :  { %v573_v45 = vmul.f32 0.7978846, %v557_v41  ;;  %1505 = vtanh.f32 %v572_v40  ;;  %v2325_v14 = vrot.slane %v2182_v47, %v174_v53  ;;  %v2328_v16 = vrot.slane %v2182_v47, %v182_v54  ;;  %v2387_v35 = vld [vmem:[%s2668_s3 + $0x3b8] sm:$0xff]  ;;  %v2396_v41 = vld [vmem:[%s2668_s3 + $0x230] sm:$0xff] }
 0x10a   :  { %v575_v48 = vmul.f32 0.7978846, %v559_v43  ;;  %1507 = vtanh.f32 %v574_v42  ;;  %v1434_v17 = vpack.c.bf16 %v2249_v52, %v2244_v51  ;;  %v1466_v22 = vpack.c.bf16 %v2261_v57, %v2256_v55  ;;  %v2401_v42 = vld [vmem:[%s2668_s3 + $0x238] sm:$0xff]  ;;  %v2408_v53 = vld [vmem:[%s2668_s3 + $0x330] sm:$0xff] }
 0x10b   :  { %1509 = vtanh.f32 %v573_v45 }
 0x10c   :  { %1511 = vtanh.f32 %v575_v48 }
 0x10f   :  { %v1498_v6 = vpop.eup %1497 }
 0x110   :  { %v1500_v12 = vpop.eup %1499  ;;  %v596_v13 = vadd.f32 1.0, %v1498_v6 }
 0x111   :  { %v1502_v47 = vpop.eup %1501  ;;  %v598_v21 = vadd.f32 1.0, %v1500_v12 }
 0x112   :  { %v1504_v28 = vpop.eup %1503  ;;  %v597_v29 = vadd.f32 1.0, %v1502_v47  ;;  %v612_v37 = vmul.f32 0.5, %v596_v13  ;;  %v1446_v13 = vpack.c.bf16 %v2401_v42, %v2396_v41  ;;  %v750_v41 = vld [vmem:[%s2668_s3 + $0x350] sm:$0xff]  ;;  %v751_v42 = vld [vmem:[%s2668_s3 + $0x358] sm:$0xff] }
 0x113   :  { %v1506_v36 = vpop.eup %1505  ;;  %v599_v38 = vadd.f32 1.0, %v1504_v28  ;;  %v614_v45 = vmul.f32 0.5, %v598_v21  ;;  %v2417_v21 = vld [vmem:[%s2668_s3 + $0x338] sm:$0xff]  ;;  %v2422_v28 = vld [vmem:[%s2668_s3 + $0x2c0] sm:$0xff] }
 0x114   :  { %v1508_v43 = vpop.eup %1507  ;;  %v613_v48 = vmul.f32 0.5, %v597_v29  ;;  %v604_v49 = vadd.f32 1.0, %v1506_v36  ;;  %v2427_v29 = vld [vmem:[%s2668_s3 + $0x2c8] sm:$0xff]  ;;  %v628_v50 = vmul.f32 %v612_v37, %v2191_v56  ;;  %v1478_v23 = vpack.c.bf16 %v2417_v21, %v2408_v53  ;;  %v736_v53 = vld [vmem:[%s2668_s3 + $0x2e0] sm:$0xff] }
 0x115   :  { %v1510_v54 = vpop.eup %1509  ;;  %v615_v6 = vmul.f32 0.5, %v599_v38  ;;  %v606_v12 = vadd.f32 1.0, %v1508_v43  ;;  %v630_v31 = vmul.f32 %v614_v45, %v2193_v59  ;;  %v2447_v45 = vld [vmem:[%s2668_s3 + $0x3c0] sm:$0xff]  ;;  %v737_v21 = vld [vmem:[%s2668_s3 + $0x2e8] sm:$0xff] }
 0x116   :  { %v1512_v36 = vpop.eup %1511  ;;  %v629_v38 = vmul.f32 %v613_v48, %v2195_v60  ;;  %v605_v43 = vadd.f32 1.0, %v1510_v54  ;;  %v620_v47 = vmul.f32 0.5, %v604_v49  ;;  %v1448_v60 = vpack.c.bf16 %v2427_v29, %v2422_v28  ;;  %v768_v28 = vld [vmem:[%s2668_s3 + $0x3e0] sm:$0xff]  ;;  %v769_v29 = vld [vmem:[%s2668_s3 + $0x3e8] sm:$0xff] }
 0x117   :  { %v631_v40 = vmul.f32 %v615_v6, %v2199_v0  ;;  %v607_v39 = vadd.f32 1.0, %v1512_v36  ;;  %v622_v32 = vmul.f32 0.5, %v606_v12  ;;  %v2672_v54 = vpack.c.bf16 %v2271_v44, %v2266_v58 }
 0x118   :  { %843 = vmatprep.mubr.f32.mxu0 %v629_v38  ;;  %v412_v30 = vpop.f32.mrb[4].mxu0  ;;  %v621_v24 = vmul.f32 0.5, %v605_v43  ;;  %v636_v49 = vmul.f32 %v620_v47, %v2208_v7  ;;  %v2674_v43 = vpack.c.bf16 %v2291_v2, %v2286_v1  ;;  %v2677_v1 = vpack.c.bf16 %v2335_v18, %v2322_v11 }
 0x119   :  { %918 = vmatprep.mubr.f32.mxu1 %v631_v40  ;;  %v2440_v48 = vadd.f32 %v412_v30, %v2304_v8  ;;  %v489_v56 = vpop.f32.mrb[4].mxu1  ;;  %844 = vmatmul.mubr.f32.vlgmr.msra.gmra.mrb[8].mxu0 %v628_v50  ;;  %v414_v0 = vpop.f32.mrb[5].mxu0  ;;  %v623_v37 = vmul.f32 0.5, %v607_v39  ;;  %v638_v59 = vmul.f32 %v622_v32, %v2212_v3  ;;  %v2452_v40 = vld [vmem:[%s2668_s3 + $0x3c8] sm:$0xff] }
 0x11a   :  { %v2455_v30 = vadd.f32 %v489_v56, %v2307_v9  ;;  %919 = vmatmul.mubr.f32.vlgmr.msra.gmra.mrb[8].mxu1 %v630_v31  ;;  %v2458_v39 = vadd.f32 %v414_v0, %v2325_v14  ;;  %v491_v7 = vpop.f32.mrb[5].mxu1  ;;  %1435 = vmatpush3.bf16.msra.mxu0 %v1434_v17  ;;  %v637_v3 = vmul.f32 %v621_v24, %v2214_v61 }
 0x11b   :  { %v504_v32 = vmul.f32 %v2440_v48, %v2440_v48  ;;  %v2467_v50 = vadd.f32 %v491_v7, %v2328_v16  ;;  %1467 = vmatpush3.bf16.msra.mxu1 %v1466_v22  ;;  %v639_v31 = vmul.f32 %v623_v37, %v2219_v15  ;;  %1437 = vmatprep.subr.bf16.mxu0 %v2672_v54 }
 0x11c   :  { %v506_v51 = vmul.f32 %v2455_v30, %v2455_v30  ;;  %v505_v61 = vmul.f32 %v2458_v39, %v2458_v39  ;;  %848 = vmatprep.mubr.f32.mxu0 %v637_v3  ;;  %v418_v52 = vpop.f32.mrb[6].mxu0  ;;  %v2673_v17 = vpack.c.bf16 %v2281_v63, %v2276_v62  ;;  %v1480_v55 = vpack.c.bf16 %v2452_v40, %v2447_v45  ;;  %v748_v3 = vld [vmem:[%s2668_s3 + $0x340] sm:$0xff] }
 0x11d   :  { %v520_v15 = vmul.f32 %v504_v32, %v2440_v48  ;;  %v507_v57 = vmul.f32 %v2467_v50, %v2467_v50  ;;  %923 = vmatprep.mubr.f32.mxu1 %v639_v31  ;;  %v2489_v58 = vadd.f32 %v418_v52, %v2304_v8  ;;  %v495_v44 = vpop.f32.mrb[6].mxu1  ;;  %849 = vmatmul.mubr.f32.gmra.mrb[10].mxu0 %v636_v49  ;;  %v420_v22 = vpop.f32.mrb[7].mxu0  ;;  %v749_v32 = vld [vmem:[%s2668_s3 + $0x348] sm:$0xff] }
 0x11e   :  { %1469 = vmatprep.subr.bf16.mxu1 %v2673_v17  ;;  %v522_v24 = vmul.f32 %v506_v51, %v2455_v30  ;;  %v521_v62 = vmul.f32 %v505_v61, %v2458_v39  ;;  %v2494_v63 = vadd.f32 %v495_v44, %v2307_v9  ;;  %924 = vmatmul.mubr.f32.gmra.mrb[10].mxu1 %v638_v59  ;;  %v497_v12 = vpop.f32.mrb[7].mxu1  ;;  %v716_v59 = vld [vmem:[%s2668_s3 + $0x240] sm:$0xff] }
 0x11f   :  { %v2497_v6 = vadd.f32 %v420_v22, %v2325_v14  ;;  %v536_v47 = vmul.f32 0.044715, %v520_v15  ;;  %v523_v36 = vmul.f32 %v507_v57, %v2467_v50  ;;  %v512_v8 = vmul.f32 %v2489_v58, %v2489_v58  ;;  %1439 = vmatpush3.bf16.msra.mxu0 %v2674_v43  ;;  %v734_v15 = vld [vmem:[%s2668_s3 + $0x2d0] sm:$0xff]  ;;  %v735_v57 = vld [vmem:[%s2668_s3 + $0x2d8] sm:$0xff] }
 0x120   :  { %v2503_v38 = vadd.f32 %v497_v12, %v2328_v16  ;;  %v2675_v9 = vpack.c.bf16 %v2301_v5, %v2296_v4  ;;  %v538_v14 = vmul.f32 0.044715, %v522_v24  ;;  %v537_v56 = vmul.f32 0.044715, %v521_v62 }
 0x121   :  { %v514_v0 = vmul.f32 %v2494_v63, %v2494_v63  ;;  %v513_v37 = vmul.f32 %v2497_v6, %v2497_v6  ;;  %v2676_v16 = vpack.c.bf16 %v2317_v10, %v2312_v46  ;;  %v552_v2 = vadd.f32 %v536_v47, %v2440_v48  ;;  %v717_v46 = vld [vmem:[%s2668_s3 + $0x248] sm:$0xff]  ;;  %v766_v47 = vld [vmem:[%s2668_s3 + $0x3d0] sm:$0xff] }
 0x122   :  { %1471 = vmatpush3.bf16.msra.mxu1 %v2675_v9  ;;  %v539_v4 = vmul.f32 0.044715, %v523_v36  ;;  %v528_v5 = vmul.f32 %v512_v8, %v2489_v58  ;;  %v515_v49 = vmul.f32 %v2503_v38, %v2503_v38  ;;  %v554_v10 = vadd.f32 %v538_v14, %v2455_v30  ;;  %v767_v36 = vld [vmem:[%s2668_s3 + $0x3d8] sm:$0xff]  ;;  %v718_v9 = vld [vmem:[%s2668_s3 + $0x250] sm:$0xff] }
 0x123   :  { %1441 = vmatprep.subr.bf16.mxu0 %v2676_v16  ;;  %1473 = vmatprep.subr.bf16.mxu1 %v2677_v1  ;;  %v553_v11 = vadd.f32 %v537_v56, %v2458_v39  ;;  %v530_v18 = vmul.f32 %v514_v0, %v2494_v63  ;;  %v529_v7 = vmul.f32 %v513_v37, %v2497_v6  ;;  %v568_v31 = vmul.f32 0.7978846, %v552_v2  ;;  %v719_v14 = vld [vmem:[%s2668_s3 + $0x258] sm:$0xff]  ;;  %v721_v37 = vld [vmem:[%s2668_s3 + $0x268] sm:$0xff]  ;;  %v752_v2 = vld [vmem:[%s2668_s3 + $0x360] sm:$0xff] }
 0x124   :  { %v555_v54 = vadd.f32 %v539_v4, %v2467_v50  ;;  %v544_v51 = vmul.f32 0.044715, %v528_v5  ;;  %v531_v61 = vmul.f32 %v515_v49, %v2503_v38  ;;  %v2678_v52 = vpack.c.bf16 %v2345_v20, %v2340_v19  ;;  %v753_v4 = vld [vmem:[%s2668_s3 + $0x368] sm:$0xff]  ;;  %v738_v5 = vld [vmem:[%s2668_s3 + $0x2f0] sm:$0xff]  ;;  %v739_v49 = vld [vmem:[%s2668_s3 + $0x2f8] sm:$0xff] }
 0x125   :  { %v2679_v17 = vpack.c.bf16 %v2361_v26, %v2356_v25  ;;  %v570_v44 = vmul.f32 0.7978846, %v554_v10  ;;  %v569_v22 = vmul.f32 0.7978846, %v553_v11  ;;  %v546_v24 = vmul.f32 0.044715, %v530_v18 }
 0x126   :  { %1443 = vmatpush3.bf16.msra.mxu0 %v2678_v52  ;;  %v2680_v62 = vpack.c.bf16 %v2377_v33, %v2366_v27  ;;  %v2681_v19 = vpack.c.bf16 %v2387_v35, %v2382_v34  ;;  %v1450_v20 = vpack.c.bf16 %v717_v46, %v716_v59  ;;  %1513 = vtanh.f32 %v568_v31  ;;  %v770_v59 = vld [vmem:[%s2668_s3 + $0x3f0] sm:$0xff]  ;;  %v771_v46 = vld [vmem:[%s2668_s3 + $0x3f8] sm:$0xff] }
 0x127   :  { %1475 = vmatpush3.bf16.msra.mxu1 %v2679_v17  ;;  %v571_v25 = vmul.f32 0.7978846, %v555_v54  ;;  %v560_v26 = vadd.f32 %v544_v51, %v2489_v58  ;;  %v545_v12 = vmul.f32 0.044715, %v529_v7  ;;  %1515 = vtanh.f32 %v570_v44  ;;  %v722_v7 = vld [vmem:[%s2668_s3 + $0x270] sm:$0xff]  ;;  %v723_v51 = vld [vmem:[%s2668_s3 + $0x278] sm:$0xff] }
 0x128   :  { %1445 = vmatprep.subr.bf16.mxu0 %v2680_v62  ;;  %1477 = vmatprep.subr.bf16.mxu1 %v2681_v19  ;;  %v562_v27 = vadd.f32 %v546_v24, %v2494_v63  ;;  %v547_v33 = vmul.f32 0.044715, %v531_v61  ;;  %v1482_v34 = vpack.c.bf16 %v749_v32, %v748_v3  ;;  %v1452_v43 = vpack.c.bf16 %v735_v57, %v734_v15  ;;  %v754_v61 = vld [vmem:[%s2668_s3 + $0x370] sm:$0xff]  ;;  %v755_v52 = vld [vmem:[%s2668_s3 + $0x378] sm:$0xff] }
 0x129   :  { %v576_v35 = vmul.f32 0.7978846, %v560_v26  ;;  %v561_v8 = vadd.f32 %v545_v12, %v2497_v6  ;;  %1517 = vtanh.f32 %v569_v22  ;;  %v1454_v45 = vpack.c.bf16 %v719_v14, %v718_v9 }
 0x12a   :  { %1447 = vmatpush3.bf16.msra.mxu0 %v1446_v13  ;;  %v578_v56 = vmul.f32 0.7978846, %v562_v27  ;;  %v563_v0 = vadd.f32 %v547_v33, %v2503_v38  ;;  %1519 = vtanh.f32 %v571_v25  ;;  %v1486_v40 = vpack.c.bf16 %v751_v42, %v750_v41 }
 0x12b   :  { %1479 = vmatpush3.bf16.msra.mxu1 %v1478_v23  ;;  %1449 = vmatprep.subr.bf16.mxu0 %v1448_v60  ;;  %v1484_v23 = vpack.c.bf16 %v767_v36, %v766_v47  ;;  %v577_v13 = vmul.f32 0.7978846, %v561_v8  ;;  %1521 = vtanh.f32 %v576_v35  ;;  %v1456_v16 = vpack.c.bf16 %v737_v21, %v736_v53  ;;  %v1087_v21 = vld [vmem:[%s2670_s4] ss:$0 sm:$0xff] }
 0x12c   :  { %1481 = vmatprep.subr.bf16.mxu1 %v1480_v55  ;;  %v579_v60 = vmul.f32 0.7978846, %v563_v0  ;;  %1523 = vtanh.f32 %v578_v56  ;;  %v720_v55 = vld [vmem:[%s2668_s3 + $0x260] sm:$0xff]  ;;  %v1488_v1 = vpack.c.bf16 %v769_v29, %v768_v28  ;;  %v1490_v18 = vpack.c.bf16 %v753_v4, %v752_v2 }
 0x12d   :  { %1525 = vtanh.f32 %v577_v13  ;;  %v1458_v11 = vpack.c.bf16 %v721_v37, %v720_v55  ;;  %v1460_v31 = vpack.c.bf16 %v739_v49, %v738_v5  ;;  %v1492_v54 = vpack.c.bf16 %v771_v46, %v770_v59 }
 0x12e   :  { %1451 = vmatpush3.bf16.msra.mxu0 %v1450_v20  ;;  %1527 = vtanh.f32 %v579_v60  ;;  %v1462_v62 = vpack.c.bf16 %v723_v51, %v722_v7  ;;  %v1494_v19 = vpack.c.bf16 %v755_v52, %v754_v61  ;;  %v1529_v61 = vld [vmem:[%s2667_s0] sm:$0xff] }
 0x12f   :  { %1483 = vmatpush3.bf16.msra.mxu1 %v1482_v34  ;;  %1453 = vmatprep.subr.bf16.mxu0 %v1452_v43 }
 0x130   :  { %1485 = vmatprep.subr.bf16.mxu1 %v1484_v23  ;;  %v1514_v10 = vpop.eup %1513 }
 0x131   :  { %v1516_v3 = vpop.eup %1515  ;;  %v600_v32 = vadd.f32 1.0, %v1514_v10 }
 0x132   :  { %1455 = vmatpush3.bf16.msra.mxu0 %v1454_v45  ;;  %v602_v15 = vadd.f32 1.0, %v1516_v3 }
 0x133   :  { %1487 = vmatpush3.bf16.msra.mxu1 %v1486_v40  ;;  %1457 = vmatprep.subr.bf16.mxu0 %v1456_v16  ;;  %v1518_v17 = vpop.eup %1517  ;;  %v616_v24 = vmul.f32 0.5, %v600_v32 }
 0x134   :  { %1489 = vmatprep.subr.bf16.mxu1 %v1488_v1  ;;  %v1520_v57 = vpop.eup %1519  ;;  %v601_v44 = vadd.f32 1.0, %v1518_v17  ;;  %v618_v26 = vmul.f32 0.5, %v602_v15 }
 0x135   :  { %v1522_v22 = vpop.eup %1521  ;;  %v603_v20 = vadd.f32 1.0, %v1520_v57  ;;  %v632_v43 = vmul.f32 %v616_v24, %v2440_v48  ;;  %v1530_v57 = vld [vmem:[%s2667_s0 + $0x8] sm:$0xff] }
 0x136   :  { %1459 = vmatpush3.bf16.msra.mxu0 %v1458_v11  ;;  %v1524_v25 = vpop.eup %1523  ;;  %v617_v12 = vmul.f32 0.5, %v601_v44  ;;  %v608_v47 = vadd.f32 1.0, %v1522_v22  ;;  %v634_v56 = vmul.f32 %v618_v26, %v2455_v30 }
 0x137   :  { %1491 = vmatpush3.bf16.msra.mxu1 %v1490_v18  ;;  %1461 = vmatprep.subr.bf16.mxu0 %v1460_v31  ;;  %v1526_v36 = vpop.eup %1525  ;;  %v619_v27 = vmul.f32 0.5, %v603_v20  ;;  %v610_v33 = vadd.f32 1.0, %v1524_v25 }
 0x138   :  { %1493 = vmatprep.subr.bf16.mxu1 %v1492_v54  ;;  %v1528_v34 = vpop.eup %1527  ;;  %v633_v35 = vmul.f32 %v617_v12, %v2458_v39  ;;  %v609_v8 = vadd.f32 1.0, %v1526_v36  ;;  %v624_v23 = vmul.f32 0.5, %v608_v47 }
 0x139   :  { %v635_v9 = vmul.f32 %v619_v27, %v2467_v50  ;;  %v611_v14 = vadd.f32 1.0, %v1528_v34  ;;  %v626_v41 = vmul.f32 0.5, %v610_v33 }
 0x13a   :  { %1463 = vmatpush3.bf16.msra.mxu0 %v1462_v62  ;;  %993 = vmatprep.mubr.f32.mxu0 %v633_v35  ;;  %v625_v0 = vmul.f32 0.5, %v609_v8  ;;  %v640_v48 = vmul.f32 %v624_v23, %v2489_v58 }
 0x13b   :  { %1495 = vmatpush3.bf16.msra.mxu1 %v1494_v19  ;;  %1068 = vmatprep.mubr.f32.mxu1 %v635_v9  ;;  %v627_v42 = vmul.f32 0.5, %v611_v14  ;;  %v642_v50 = vmul.f32 %v626_v41, %v2494_v63 }
 0x13c   :  { %v641_v39 = vmul.f32 %v625_v0, %v2497_v6 }
 0x13d   :  { %994 = vmatmul.mubr.f32.vlgmr.msra.gmra.mrb[12].mxu0 %v632_v43  ;;  %v643_v53 = vmul.f32 %v627_v42, %v2503_v38 }
 0x13e   :  { %1069 = vmatmul.mubr.f32.vlgmr.msra.gmra.mrb[12].mxu1 %v634_v56  ;;  %998 = vmatprep.mubr.f32.mxu0 %v641_v39 }
 0x13f   :  { %1073 = vmatprep.mubr.f32.mxu1 %v643_v53 }
 0x141   :  { %999 = vmatmul.mubr.f32.gmra.mrb[14].mxu0 %v640_v48 }
 0x142   :  { %1074 = vmatmul.mubr.f32.gmra.mrb[14].mxu1 %v642_v50 }
 0x1ec   :  { %v1120_v30 = vpop.f32.mrb[8].mxu0 }
 0x1ed   :  { %v1158_v13 = vpop.f32.mrb[8].mxu1  ;;  %v1121_v28 = vpop.f32.mrb[9].mxu0 }
 0x1ee   :  { %v1122_v29 = vadd.f32 %v1121_v28, %v1120_v30  ;;  %v1159_v60 = vpop.f32.mrb[9].mxu1 }
 0x1ef   :  { %v1160_v6 = vadd.f32 %v1159_v60, %v1158_v13 }
 0x1f0   :  { %v846_v45 = vadd.f32 %v1122_v29, %v1087_v21  ;;  %v1123_v38 = vpop.f32.mrb[10].mxu0 }
 0x1f1   :  { %v1161_v40 = vpop.f32.mrb[10].mxu1  ;;  %v1124_v55 = vpop.f32.mrb[11].mxu0 }
 0x1f2   :  { %v921_v58 = vadd.f32 %v1160_v6, %v846_v45  ;;  %v1125_v37 = vadd.f32 %v1124_v55, %v1123_v38  ;;  %v1162_v63 = vpop.f32.mrb[11].mxu1 }
 0x1f3   :  { %v1163_v16 = vadd.f32 %v1162_v63, %v1161_v40 }
 0x1f4   :  { %v851_v1 = vadd.f32 %v1125_v37, %v1087_v21 }
 0x1f6   :  { %v926_v2 = vadd.f32 %v1163_v16, %v851_v1 }
 0x210   :  { %v1196_v4 = vpop.f32.mrb[12].mxu0 }
 0x211   :  { %v1234_v5 = vpop.f32.mrb[12].mxu1  ;;  %v1197_v49 = vpop.f32.mrb[13].mxu0 }
 0x212   :  { %v1235_v59 = vpop.f32.mrb[13].mxu1  ;;  %v1198_v46 = vadd.f32 %v1197_v49, %v1196_v4 }
 0x213   :  { %v1236_v10 = vadd.f32 %v1235_v59, %v1234_v5 }
 0x214   :  { %v996_v11 = vadd.f32 %v1198_v46, %v921_v58  ;;  %v1199_v18 = vpop.f32.mrb[14].mxu0 }
 0x215   :  { %v1237_v7 = vpop.f32.mrb[14].mxu1  ;;  %v1200_v3 = vpop.f32.mrb[15].mxu0 }
 0x216   :  { %v1238_v32 = vpop.f32.mrb[15].mxu1  ;;  %v1071_v31 = vadd.f32 %v1236_v10, %v996_v11  ;;  %v1201_v54 = vadd.f32 %v1200_v3, %v1199_v18 }
 0x217   :  { %v1239_v51 = vadd.f32 %v1238_v32, %v1237_v7 }
 0x218   :  { %v1079_v52 = vadd.f32 %v1529_v61, %v1071_v31  ;;  %v1001_v17 = vadd.f32 %v1201_v54, %v926_v2 }
 0x21a   :  { %1081 = vst [vmem:[%s2671_s5] sm:$0xff] %v1079_v52  ;;  %v1076_v15 = vadd.f32 %v1239_v51, %v1001_v17 }
 0x21c   :  { %v1080_v44 = vadd.f32 %v1530_v57, %v1076_v15 }
 0x21e   :  { %1082 = vst [vmem:[%s2671_s5 + $0x8] sm:$0xff] %v1080_v44 }

</bundles_post_ra>
